<compile_context>
chip_gen: v6e
topology: v6e:2x2x1
jax: 0.10.0
libtpu: 0.0.40
codegen_flags: <defaults>
</compile_context>

<pallas_src>
import functools

import jax
import jax.numpy as jnp
from jax import lax
from jax.experimental import pallas as pl
from jax.experimental.pallas import tpu as pltpu


def attention_kernel(x_ref, gamma_ref, beta_ref, w_qkv_ref, w_out_ref,
                     b_out_ref, o_ref, acc_ref, *, heads, dim_head, scale, eps):
    """One grid step handles one batch element: (N, D) -> (N, D)."""
    _, N, D = x_ref.shape
    inner = heads * dim_head

    x = x_ref[0].astype(jnp.float32)                        # (N, D)

    # ---- LayerNorm over last dim (eps=1e-5, elementwise affine), f32 VPU ----
    mean = jnp.mean(x, axis=-1, keepdims=True)
    var = jnp.mean((x - mean) ** 2, axis=-1, keepdims=True)
    xn = (x - mean) * lax.rsqrt(var + eps)
    xn = xn * gamma_ref[0] + beta_ref[0]                    # (N, D) f32

    # ---- fused QKV projection: ONE lane-dense MXU matmul, K = D ----
    # (N, D) bf16 @ (D, 3*inner) bf16 -> (N, 3*inner) f32 accumulation.
    qkv = jnp.dot(xn.astype(jnp.bfloat16), w_qkv_ref[...],
                  preferred_element_type=jnp.float32)       # (N, 3*inner) f32

    # ---- per-head attention + fused output-projection accumulation ----
    # Accumulator initialised with the output bias (broadcast over rows).
    acc_ref[...] = jnp.broadcast_to(b_out_ref[0], acc_ref.shape)

    # Static unroll over heads (heads is a small compile-time constant); only
    # the intrinsically per-head dh-contraction matmuls live inside the loop.
    for h in range(heads):
        c0 = h * dim_head
        # Static lane slices of the fused projection (column layout matches
        # torch's chunk(3) + rearrange 'b n (h d) -> b h n d').
        q_h = (qkv[:, c0:c0 + dim_head] * scale).astype(jnp.bfloat16)   # (N, dh)
        k_h = qkv[:, inner + c0:inner + c0 + dim_head].astype(jnp.bfloat16)
        v_h = qkv[:, 2 * inner + c0:2 * inner + c0 + dim_head].astype(jnp.bfloat16)

        # scores: contract dh directly (no explicit transpose) -> (N, N) f32
        dots = lax.dot_general(q_h, k_h, (((1,), (1,)), ((), ())),
                               preferred_element_type=jnp.float32)

        # softmax over keys, f32 (approx reciprocal goes to the EUP slot).
        m = jnp.max(dots, axis=-1, keepdims=True)
        p = jnp.exp(dots - m)
        attn = p * pl.reciprocal(jnp.sum(p, axis=-1, keepdims=True), approx=True)
        # Dropout(p=0.0) == identity (eval semantics); nothing to do.

        # context: (N, N) @ (N, dh) -> (N, dh), f32 accumulation
        ctx = jnp.dot(attn.astype(jnp.bfloat16), v_h,
                      preferred_element_type=jnp.float32)

        # output projection, head-h slice of the lane-dense W_out (dh, D);
        # accumulate into a single f32 (N, D) scratch -- no (H, N, D) partial.
        acc_ref[...] += jnp.dot(ctx.astype(jnp.bfloat16),
                                w_out_ref[c0:c0 + dim_head, :],
                                preferred_element_type=jnp.float32)

    o_ref[0] = acc_ref[...].astype(o_ref.dtype)


def attention_pallas(x, gamma, beta, w_qkv, w_out, b_out, *, heads, dim_head):
    """x: (B, N, D); w_qkv = to_qkv.weight.T (D, 3*inner); w_out = to_out[0].weight.T (inner, D)."""
    B, N, D = x.shape
    inner = heads * dim_head
    scale = dim_head ** (-0.5)

    # Lane-dense bf16 weights (halve HBM->VMEM traffic; f32 MXU accumulation
    # inside the kernel preserves accuracy).  No per-head relayout needed.
    w_qkv_bf = w_qkv.astype(jnp.bfloat16)                   # (D, 3*inner)
    w_out_bf = w_out.astype(jnp.bfloat16)                   # (inner, D)

    kernel = functools.partial(attention_kernel, heads=heads,
                               dim_head=dim_head, scale=scale, eps=1e-5)

    def build(single_buffer_consts):
        # Grid-invariant operands (index_map constant in b): single-buffer them
        # when supported -- default double buffering would waste VMEM on blocks
        # that never change (matters at ViT-Base scale, esp. on v7x's 64 MiB).
        def const_spec(shape):
            index_map = lambda b: (0,) * len(shape)
            if single_buffer_consts:
                return pl.BlockSpec(shape, index_map,
                                    pipeline_mode=pl.Buffered(1))
            return pl.BlockSpec(shape, index_map)

        return pl.pallas_call(
            kernel,
            out_shape=jax.ShapeDtypeStruct((B, N, D), x.dtype),
            grid_spec=pltpu.PrefetchScalarGridSpec(
                num_scalar_prefetch=0,
                # One batch element per step.  For long sequences add a
                # query-tile axis (flash-style KV loop) to get >= 4-8 pipeline
                # steps per TensorCore and bound the N^2 term on v7x.
                grid=(B,),
                in_specs=[
                    pl.BlockSpec((1, N, D), lambda b: (b, 0, 0)),   # x (per batch)
                    const_spec((1, D)),                              # LN gamma
                    const_spec((1, D)),                              # LN beta
                    const_spec((D, 3 * inner)),                      # fused W_qkv
                    const_spec((inner, D)),                          # W_out
                    const_spec((1, D)),                              # b_out
                ],
                out_specs=pl.BlockSpec((1, N, D), lambda b: (b, 0, 0)),
                scratch_shapes=[pltpu.VMEM((N, D), jnp.float32)],    # out-proj acc
            ),
            compiler_params=pltpu.CompilerParams(
                dimension_semantics=("parallel",)),
        )

    args = (x, gamma, beta, w_qkv_bf, w_out_bf, b_out)
    try:
        return build(True)(*args)
    except Exception:
        # BlockSpec.pipeline_mode / pl.Buffered(1) not supported on this JAX
        # build: fall back to default double buffering (correctness unchanged).
        return build(False)(*args)


def attention_ref(x, gamma, beta, w_qkv, w_out, b_out, *, heads, dim_head):
    """Pure-JAX f32 reference mirroring the PyTorch forward exactly."""
    B, N, D = x.shape
    inner = heads * dim_head
    scale = dim_head ** (-0.5)
    mean = jnp.mean(x, axis=-1, keepdims=True)
    var = jnp.mean((x - mean) ** 2, axis=-1, keepdims=True)
    xn = (x - mean) / jnp.sqrt(var + 1e-5) * gamma[0] + beta[0]
    qkv = xn @ w_qkv                                         # (B, N, 3*inner)
    q, k, v = jnp.split(qkv, 3, axis=-1)
    def to_heads(t):                                         # 'b n (h d) -> b h n d'
        return t.reshape(B, N, heads, dim_head).transpose(0, 2, 1, 3)
    q, k, v = map(to_heads, (q, k, v))
    dots = jnp.einsum("bhnd,bhmd->bhnm", q, k) * scale
    attn = jax.nn.softmax(dots, axis=-1)
    out = jnp.einsum("bhnm,bhmd->bhnd", attn, v)
    out = out.transpose(0, 2, 1, 3).reshape(B, N, inner)     # 'b h n d -> b n (h d)'
    return out @ w_out + b_out[0]


if __name__ == "__main__":
    # Small, module-consistent shapes (correctness check only; benchmark at
    # real ViT shapes: N~197-256, D=768, heads=12, dim_head=64).
    B, N, D = 2, 8, 32
    heads, dim_head = 4, 16          # inner_dim = 64; project_out = True
    inner = heads * dim_head

    key = jax.random.PRNGKey(0)
    kx, kq, ko, kb = jax.random.split(key, 4)

    x = jax.random.normal(kx, (B, N, D), dtype=jnp.float32)

    # Parameters in PyTorch semantics, stored transposed to (in, out).
    gamma = jnp.ones((1, D), dtype=jnp.float32)              # nn.LayerNorm weight
    beta = jnp.zeros((1, D), dtype=jnp.float32)               # nn.LayerNorm bias
    w_qkv = jax.random.normal(kq, (D, 3 * inner), jnp.float32) * 0.05   # to_qkv.weight^T
    w_out = jax.random.normal(ko, (inner, D), jnp.float32) * 0.05       # to_out[0].weight^T
    b_out = jax.random.normal(kb, (1, D), jnp.float32) * 0.05           # to_out[0].bias

    y = attention_pallas(x, gamma, beta, w_qkv, w_out, b_out,
                         heads=heads, dim_head=dim_head)
    y = jax.block_until_ready(y)

    y_ref = attention_ref(x, gamma, beta, w_qkv, w_out, b_out,
                          heads=heads, dim_head=dim_head)
    # Tolerances account for bf16 MXU inputs + approx softmax reciprocal
    # (all accumulation is f32).
    assert jnp.allclose(y, y_ref, atol=1e-2, rtol=1e-2), "mismatch vs reference"

    print("KERNEL_OK")
</pallas_src>

<mosaic_0001>
module attributes {stable_mosaic.version = 11 : i64} {
  func.func @attention_kernel(%arg0: i32, %arg1: memref<1x8x32xf32, #tpu.memory_space<vmem>>, %arg2: memref<1x32xf32, #tpu.memory_space<vmem>>, %arg3: memref<1x32xf32, #tpu.memory_space<vmem>>, %arg4: memref<32x192xbf16, #tpu.memory_space<vmem>>, %arg5: memref<64x32xbf16, #tpu.memory_space<vmem>>, %arg6: memref<1x32xf32, #tpu.memory_space<vmem>>, %arg7: memref<1x8x32xf32, #tpu.memory_space<vmem>>, %arg8: memref<8x32xf32, #tpu.memory_space<vmem>>) attributes {dimension_semantics = [#tpu.dimension_semantics<parallel>], iteration_bounds = array<i64: 2>, scalar_prefetch = 0 : i64, scratch_operands = 1 : i64, tpu.core_type = #tpu.core_type<tc>, window_params = [{transform_indices = @transform_0, window_bounds = array<i64: 1, 8, 32>}, {pipeline_mode = #tpu.pipeline_mode<synchronous>, transform_indices = @transform_1, window_bounds = array<i64: 1, 32>}, {pipeline_mode = #tpu.pipeline_mode<synchronous>, transform_indices = @transform_2, window_bounds = array<i64: 1, 32>}, {pipeline_mode = #tpu.pipeline_mode<synchronous>, transform_indices = @transform_3, window_bounds = array<i64: 32, 192>}, {pipeline_mode = #tpu.pipeline_mode<synchronous>, transform_indices = @transform_4, window_bounds = array<i64: 64, 32>}, {pipeline_mode = #tpu.pipeline_mode<synchronous>, transform_indices = @transform_5, window_bounds = array<i64: 1, 32>}, {transform_indices = @transform_6, window_bounds = array<i64: 1, 8, 32>}]} {
    %c0 = arith.constant 0 : index
    %c0_0 = arith.constant 0 : index
    %c0_1 = arith.constant 0 : index
    %0 = vector.load %arg1[%c0, %c0_0, %c0_1] : memref<1x8x32xf32, #tpu.memory_space<vmem>>, vector<1x8x32xf32>
    %1 = vector.shape_cast %0 : vector<1x8x32xf32> to vector<8x32xf32>
    %cst = arith.constant dense<0.000000e+00> : vector<8xf32>
    %2 = vector.multi_reduction <add>, %1, %cst [1] : vector<8x32xf32> to vector<8xf32>
    %3 = vector.shape_cast %2 : vector<8xf32> to vector<8x1xf32>
    %cst_2 = arith.constant 3.200000e+01 : f32
    %4 = vector.broadcast %cst_2 : f32 to vector<8x1xf32>
    %5 = arith.divf %3, %4 : vector<8x1xf32>
    %6 = vector.broadcast %5 : vector<8x1xf32> to vector<8x32xf32>
    %7 = arith.subf %1, %6 : vector<8x32xf32>
    %8 = arith.mulf %7, %7 : vector<8x32xf32>
    %cst_3 = arith.constant dense<0.000000e+00> : vector<8xf32>
    %9 = vector.multi_reduction <add>, %8, %cst_3 [1] : vector<8x32xf32> to vector<8xf32>
    %10 = vector.shape_cast %9 : vector<8xf32> to vector<8x1xf32>
    %cst_4 = arith.constant 3.200000e+01 : f32
    %11 = vector.broadcast %cst_4 : f32 to vector<8x1xf32>
    %12 = arith.divf %10, %11 : vector<8x1xf32>
    %13 = vector.broadcast %5 : vector<8x1xf32> to vector<8x32xf32>
    %14 = arith.subf %1, %13 : vector<8x32xf32>
    %cst_5 = arith.constant 9.99999974E-6 : f32
    %15 = vector.broadcast %cst_5 : f32 to vector<8x1xf32>
    %16 = arith.addf %12, %15 : vector<8x1xf32>
    %17 = math.rsqrt %16 : vector<8x1xf32>
    %18 = vector.broadcast %17 : vector<8x1xf32> to vector<8x32xf32>
    %19 = arith.mulf %14, %18 : vector<8x32xf32>
    %c0_6 = arith.constant 0 : index
    %c0_7 = arith.constant 0 : index
    %20 = vector.load %arg2[%c0_6, %c0_7] : memref<1x32xf32, #tpu.memory_space<vmem>>, vector<1x32xf32>
    %21 = vector.shape_cast %20 : vector<1x32xf32> to vector<32xf32>
    %22 = vector.shape_cast %21 : vector<32xf32> to vector<1x32xf32>
    %23 = vector.broadcast %22 : vector<1x32xf32> to vector<8x32xf32>
    %24 = arith.mulf %19, %23 : vector<8x32xf32>
    %c0_8 = arith.constant 0 : index
    %c0_9 = arith.constant 0 : index
    %25 = vector.load %arg3[%c0_8, %c0_9] : memref<1x32xf32, #tpu.memory_space<vmem>>, vector<1x32xf32>
    %26 = vector.shape_cast %25 : vector<1x32xf32> to vector<32xf32>
    %27 = vector.shape_cast %26 : vector<32xf32> to vector<1x32xf32>
    %28 = vector.broadcast %27 : vector<1x32xf32> to vector<8x32xf32>
    %29 = arith.addf %24, %28 : vector<8x32xf32>
    %30 = arith.truncf %29 : vector<8x32xf32> to vector<8x32xbf16>
    %c0_10 = arith.constant 0 : index
    %c0_11 = arith.constant 0 : index
    %31 = vector.load %arg4[%c0_10, %c0_11] : memref<32x192xbf16, #tpu.memory_space<vmem>>, vector<32x192xbf16>
    %cst_12 = arith.constant dense<0.000000e+00> : vector<8x192xf32>
    %32 = tpu.matmul %30, %31, %cst_12 {dimension_numbers = #tpu.dot_dimension_numbers<[1], [0], [0], [1], [0, 0, 1, 1], [], []>} : vector<8x32xbf16>, vector<32x192xbf16>, vector<8x192xf32> -> vector<8x192xf32>
    %c0_13 = arith.constant 0 : index
    %c0_14 = arith.constant 0 : index
    %33 = vector.load %arg6[%c0_13, %c0_14] : memref<1x32xf32, #tpu.memory_space<vmem>>, vector<1x32xf32>
    %34 = vector.shape_cast %33 : vector<1x32xf32> to vector<32xf32>
    %35 = vector.shape_cast %34 : vector<32xf32> to vector<1x32xf32>
    %36 = vector.broadcast %35 : vector<1x32xf32> to vector<8x32xf32>
    %c0_15 = arith.constant 0 : index
    %c0_16 = arith.constant 0 : index
    %37 = vector.load %arg8[%c0_15, %c0_16] : memref<8x32xf32, #tpu.memory_space<vmem>>, vector<8x32xf32>
    tpu.vector_store %arg8[%c0_15, %c0_16], %36 {strides = array<i32>} : memref<8x32xf32, #tpu.memory_space<vmem>>, vector<8x32xf32>,
    %38 = vector.extract_strided_slice %32 {offsets = [0, 0], sizes = [8, 16], strides = [1, 1]} : vector<8x192xf32> to vector<8x16xf32>
    %cst_17 = arith.constant 2.500000e-01 : f32
    %39 = vector.broadcast %cst_17 : f32 to vector<8x16xf32>
    %40 = arith.mulf %38, %39 : vector<8x16xf32>
    %41 = arith.truncf %40 : vector<8x16xf32> to vector<8x16xbf16>
    %42 = vector.extract_strided_slice %32 {offsets = [0, 64], sizes = [8, 16], strides = [1, 1]} : vector<8x192xf32> to vector<8x16xf32>
    %43 = arith.truncf %42 : vector<8x16xf32> to vector<8x16xbf16>
    %44 = vector.extract_strided_slice %32 {offsets = [0, 128], sizes = [8, 16], strides = [1, 1]} : vector<8x192xf32> to vector<8x16xf32>
    %45 = arith.truncf %44 : vector<8x16xf32> to vector<8x16xbf16>
    %cst_18 = arith.constant dense<0.000000e+00> : vector<8x8xf32>
    %46 = tpu.matmul %41, %43, %cst_18 {dimension_numbers = #tpu.dot_dimension_numbers<[1], [1], [0], [0], [0, 0, 1, 0], [], []>} : vector<8x16xbf16>, vector<8x16xbf16>, vector<8x8xf32> -> vector<8x8xf32>
    %cst_19 = arith.constant dense<0xFF800000> : vector<8xf32>
    %47 = vector.multi_reduction <maximumf>, %46, %cst_19 [1] : vector<8x8xf32> to vector<8xf32>
    %48 = vector.shape_cast %47 : vector<8xf32> to vector<8x1xf32>
    %49 = vector.broadcast %48 : vector<8x1xf32> to vector<8x8xf32>
    %50 = arith.subf %46, %49 : vector<8x8xf32>
    %51 = math.exp %50 : vector<8x8xf32>
    %cst_20 = arith.constant dense<0.000000e+00> : vector<8xf32>
    %52 = vector.multi_reduction <add>, %51, %cst_20 [1] : vector<8x8xf32> to vector<8xf32>
    %53 = vector.shape_cast %52 : vector<8xf32> to vector<8x1xf32>
    %54 = tpu.reciprocal %53 {approx = true} : vector<8x1xf32> -> vector<8x1xf32>
    %55 = vector.broadcast %54 : vector<8x1xf32> to vector<8x8xf32>
    %56 = arith.mulf %51, %55 : vector<8x8xf32>
    %57 = arith.truncf %56 : vector<8x8xf32> to vector<8x8xbf16>
    %cst_21 = arith.constant dense<0.000000e+00> : vector<8x16xf32>
    %58 = tpu.matmul %57, %45, %cst_21 {dimension_numbers = #tpu.dot_dimension_numbers<[1], [0], [0], [1], [0, 0, 1, 1], [], []>} : vector<8x8xbf16>, vector<8x16xbf16>, vector<8x16xf32> -> vector<8x16xf32>
    %c0_22 = arith.constant 0 : index
    %c0_23 = arith.constant 0 : index
    %59 = vector.load %arg8[%c0_22, %c0_23] : memref<8x32xf32, #tpu.memory_space<vmem>>, vector<8x32xf32>
    %60 = arith.truncf %58 : vector<8x16xf32> to vector<8x16xbf16>
    %c0_24 = arith.constant 0 : index
    %c0_25 = arith.constant 0 : index
    %61 = vector.load %arg5[%c0_24, %c0_25] : memref<64x32xbf16, #tpu.memory_space<vmem>>, vector<16x32xbf16>
    %cst_26 = arith.constant dense<0.000000e+00> : vector<8x32xf32>
    %62 = tpu.matmul %60, %61, %cst_26 {dimension_numbers = #tpu.dot_dimension_numbers<[1], [0], [0], [1], [0, 0, 1, 1], [], []>} : vector<8x16xbf16>, vector<16x32xbf16>, vector<8x32xf32> -> vector<8x32xf32>
    %63 = arith.addf %59, %62 : vector<8x32xf32>
    %c0_27 = arith.constant 0 : index
    %c0_28 = arith.constant 0 : index
    %64 = vector.load %arg8[%c0_27, %c0_28] : memref<8x32xf32, #tpu.memory_space<vmem>>, vector<8x32xf32>
    tpu.vector_store %arg8[%c0_27, %c0_28], %63 {strides = array<i32>} : memref<8x32xf32, #tpu.memory_space<vmem>>, vector<8x32xf32>,
    %65 = vector.extract_strided_slice %32 {offsets = [0, 16], sizes = [8, 16], strides = [1, 1]} : vector<8x192xf32> to vector<8x16xf32>
    %cst_29 = arith.constant 2.500000e-01 : f32
    %66 = vector.broadcast %cst_29 : f32 to vector<8x16xf32>
    %67 = arith.mulf %65, %66 : vector<8x16xf32>
    %68 = arith.truncf %67 : vector<8x16xf32> to vector<8x16xbf16>
    %69 = vector.extract_strided_slice %32 {offsets = [0, 80], sizes = [8, 16], strides = [1, 1]} : vector<8x192xf32> to vector<8x16xf32>
    %70 = arith.truncf %69 : vector<8x16xf32> to vector<8x16xbf16>
    %71 = vector.extract_strided_slice %32 {offsets = [0, 144], sizes = [8, 16], strides = [1, 1]} : vector<8x192xf32> to vector<8x16xf32>
    %72 = arith.truncf %71 : vector<8x16xf32> to vector<8x16xbf16>
    %cst_30 = arith.constant dense<0.000000e+00> : vector<8x8xf32>
    %73 = tpu.matmul %68, %70, %cst_30 {dimension_numbers = #tpu.dot_dimension_numbers<[1], [1], [0], [0], [0, 0, 1, 0], [], []>} : vector<8x16xbf16>, vector<8x16xbf16>, vector<8x8xf32> -> vector<8x8xf32>
    %cst_31 = arith.constant dense<0xFF800000> : vector<8xf32>
    %74 = vector.multi_reduction <maximumf>, %73, %cst_31 [1] : vector<8x8xf32> to vector<8xf32>
    %75 = vector.shape_cast %74 : vector<8xf32> to vector<8x1xf32>
    %76 = vector.broadcast %75 : vector<8x1xf32> to vector<8x8xf32>
    %77 = arith.subf %73, %76 : vector<8x8xf32>
    %78 = math.exp %77 : vector<8x8xf32>
    %cst_32 = arith.constant dense<0.000000e+00> : vector<8xf32>
    %79 = vector.multi_reduction <add>, %78, %cst_32 [1] : vector<8x8xf32> to vector<8xf32>
    %80 = vector.shape_cast %79 : vector<8xf32> to vector<8x1xf32>
    %81 = tpu.reciprocal %80 {approx = true} : vector<8x1xf32> -> vector<8x1xf32>
    %82 = vector.broadcast %81 : vector<8x1xf32> to vector<8x8xf32>
    %83 = arith.mulf %78, %82 : vector<8x8xf32>
    %84 = arith.truncf %83 : vector<8x8xf32> to vector<8x8xbf16>
    %cst_33 = arith.constant dense<0.000000e+00> : vector<8x16xf32>
    %85 = tpu.matmul %84, %72, %cst_33 {dimension_numbers = #tpu.dot_dimension_numbers<[1], [0], [0], [1], [0, 0, 1, 1], [], []>} : vector<8x8xbf16>, vector<8x16xbf16>, vector<8x16xf32> -> vector<8x16xf32>
    %c0_34 = arith.constant 0 : index
    %c0_35 = arith.constant 0 : index
    %86 = vector.load %arg8[%c0_34, %c0_35] : memref<8x32xf32, #tpu.memory_space<vmem>>, vector<8x32xf32>
    %87 = arith.truncf %85 : vector<8x16xf32> to vector<8x16xbf16>
    %c16 = arith.constant 16 : index
    %c0_36 = arith.constant 0 : index
    %88 = vector.load %arg5[%c16, %c0_36] : memref<64x32xbf16, #tpu.memory_space<vmem>>, vector<16x32xbf16>
    %cst_37 = arith.constant dense<0.000000e+00> : vector<8x32xf32>
    %89 = tpu.matmul %87, %88, %cst_37 {dimension_numbers = #tpu.dot_dimension_numbers<[1], [0], [0], [1], [0, 0, 1, 1], [], []>} : vector<8x16xbf16>, vector<16x32xbf16>, vector<8x32xf32> -> vector<8x32xf32>
    %90 = arith.addf %86, %89 : vector<8x32xf32>
    %c0_38 = arith.constant 0 : index
    %c0_39 = arith.constant 0 : index
    %91 = vector.load %arg8[%c0_38, %c0_39] : memref<8x32xf32, #tpu.memory_space<vmem>>, vector<8x32xf32>
    tpu.vector_store %arg8[%c0_38, %c0_39], %90 {strides = array<i32>} : memref<8x32xf32, #tpu.memory_space<vmem>>, vector<8x32xf32>,
    %92 = vector.extract_strided_slice %32 {offsets = [0, 32], sizes = [8, 16], strides = [1, 1]} : vector<8x192xf32> to vector<8x16xf32>
    %cst_40 = arith.constant 2.500000e-01 : f32
    %93 = vector.broadcast %cst_40 : f32 to vector<8x16xf32>
    %94 = arith.mulf %92, %93 : vector<8x16xf32>
    %95 = arith.truncf %94 : vector<8x16xf32> to vector<8x16xbf16>
    %96 = vector.extract_strided_slice %32 {offsets = [0, 96], sizes = [8, 16], strides = [1, 1]} : vector<8x192xf32> to vector<8x16xf32>
    %97 = arith.truncf %96 : vector<8x16xf32> to vector<8x16xbf16>
    %98 = vector.extract_strided_slice %32 {offsets = [0, 160], sizes = [8, 16], strides = [1, 1]} : vector<8x192xf32> to vector<8x16xf32>
    %99 = arith.truncf %98 : vector<8x16xf32> to vector<8x16xbf16>
    %cst_41 = arith.constant dense<0.000000e+00> : vector<8x8xf32>
    %100 = tpu.matmul %95, %97, %cst_41 {dimension_numbers = #tpu.dot_dimension_numbers<[1], [1], [0], [0], [0, 0, 1, 0], [], []>} : vector<8x16xbf16>, vector<8x16xbf16>, vector<8x8xf32> -> vector<8x8xf32>
    %cst_42 = arith.constant dense<0xFF800000> : vector<8xf32>
    %101 = vector.multi_reduction <maximumf>, %100, %cst_42 [1] : vector<8x8xf32> to vector<8xf32>
    %102 = vector.shape_cast %101 : vector<8xf32> to vector<8x1xf32>
    %103 = vector.broadcast %102 : vector<8x1xf32> to vector<8x8xf32>
    %104 = arith.subf %100, %103 : vector<8x8xf32>
    %105 = math.exp %104 : vector<8x8xf32>
    %cst_43 = arith.constant dense<0.000000e+00> : vector<8xf32>
    %106 = vector.multi_reduction <add>, %105, %cst_43 [1] : vector<8x8xf32> to vector<8xf32>
    %107 = vector.shape_cast %106 : vector<8xf32> to vector<8x1xf32>
    %108 = tpu.reciprocal %107 {approx = true} : vector<8x1xf32> -> vector<8x1xf32>
    %109 = vector.broadcast %108 : vector<8x1xf32> to vector<8x8xf32>
    %110 = arith.mulf %105, %109 : vector<8x8xf32>
    %111 = arith.truncf %110 : vector<8x8xf32> to vector<8x8xbf16>
    %cst_44 = arith.constant dense<0.000000e+00> : vector<8x16xf32>
    %112 = tpu.matmul %111, %99, %cst_44 {dimension_numbers = #tpu.dot_dimension_numbers<[1], [0], [0], [1], [0, 0, 1, 1], [], []>} : vector<8x8xbf16>, vector<8x16xbf16>, vector<8x16xf32> -> vector<8x16xf32>
    %c0_45 = arith.constant 0 : index
    %c0_46 = arith.constant 0 : index
    %113 = vector.load %arg8[%c0_45, %c0_46] : memref<8x32xf32, #tpu.memory_space<vmem>>, vector<8x32xf32>
    %114 = arith.truncf %112 : vector<8x16xf32> to vector<8x16xbf16>
    %c32 = arith.constant 32 : index
    %c0_47 = arith.constant 0 : index
    %115 = vector.load %arg5[%c32, %c0_47] : memref<64x32xbf16, #tpu.memory_space<vmem>>, vector<16x32xbf16>
    %cst_48 = arith.constant dense<0.000000e+00> : vector<8x32xf32>
    %116 = tpu.matmul %114, %115, %cst_48 {dimension_numbers = #tpu.dot_dimension_numbers<[1], [0], [0], [1], [0, 0, 1, 1], [], []>} : vector<8x16xbf16>, vector<16x32xbf16>, vector<8x32xf32> -> vector<8x32xf32>
    %117 = arith.addf %113, %116 : vector<8x32xf32>
    %c0_49 = arith.constant 0 : index
    %c0_50 = arith.constant 0 : index
    %118 = vector.load %arg8[%c0_49, %c0_50] : memref<8x32xf32, #tpu.memory_space<vmem>>, vector<8x32xf32>
    tpu.vector_store %arg8[%c0_49, %c0_50], %117 {strides = array<i32>} : memref<8x32xf32, #tpu.memory_space<vmem>>, vector<8x32xf32>,
    %119 = vector.extract_strided_slice %32 {offsets = [0, 48], sizes = [8, 16], strides = [1, 1]} : vector<8x192xf32> to vector<8x16xf32>
    %cst_51 = arith.constant 2.500000e-01 : f32
    %120 = vector.broadcast %cst_51 : f32 to vector<8x16xf32>
    %121 = arith.mulf %119, %120 : vector<8x16xf32>
    %122 = arith.truncf %121 : vector<8x16xf32> to vector<8x16xbf16>
    %123 = vector.extract_strided_slice %32 {offsets = [0, 112], sizes = [8, 16], strides = [1, 1]} : vector<8x192xf32> to vector<8x16xf32>
    %124 = arith.truncf %123 : vector<8x16xf32> to vector<8x16xbf16>
    %125 = vector.extract_strided_slice %32 {offsets = [0, 176], sizes = [8, 16], strides = [1, 1]} : vector<8x192xf32> to vector<8x16xf32>
    %126 = arith.truncf %125 : vector<8x16xf32> to vector<8x16xbf16>
    %cst_52 = arith.constant dense<0.000000e+00> : vector<8x8xf32>
    %127 = tpu.matmul %122, %124, %cst_52 {dimension_numbers = #tpu.dot_dimension_numbers<[1], [1], [0], [0], [0, 0, 1, 0], [], []>} : vector<8x16xbf16>, vector<8x16xbf16>, vector<8x8xf32> -> vector<8x8xf32>
    %cst_53 = arith.constant dense<0xFF800000> : vector<8xf32>
    %128 = vector.multi_reduction <maximumf>, %127, %cst_53 [1] : vector<8x8xf32> to vector<8xf32>
    %129 = vector.shape_cast %128 : vector<8xf32> to vector<8x1xf32>
    %130 = vector.broadcast %129 : vector<8x1xf32> to vector<8x8xf32>
    %131 = arith.subf %127, %130 : vector<8x8xf32>
    %132 = math.exp %131 : vector<8x8xf32>
    %cst_54 = arith.constant dense<0.000000e+00> : vector<8xf32>
    %133 = vector.multi_reduction <add>, %132, %cst_54 [1] : vector<8x8xf32> to vector<8xf32>
    %134 = vector.shape_cast %133 : vector<8xf32> to vector<8x1xf32>
    %135 = tpu.reciprocal %134 {approx = true} : vector<8x1xf32> -> vector<8x1xf32>
    %136 = vector.broadcast %135 : vector<8x1xf32> to vector<8x8xf32>
    %137 = arith.mulf %132, %136 : vector<8x8xf32>
    %138 = arith.truncf %137 : vector<8x8xf32> to vector<8x8xbf16>
    %cst_55 = arith.constant dense<0.000000e+00> : vector<8x16xf32>
    %139 = tpu.matmul %138, %126, %cst_55 {dimension_numbers = #tpu.dot_dimension_numbers<[1], [0], [0], [1], [0, 0, 1, 1], [], []>} : vector<8x8xbf16>, vector<8x16xbf16>, vector<8x16xf32> -> vector<8x16xf32>
    %c0_56 = arith.constant 0 : index
    %c0_57 = arith.constant 0 : index
    %140 = vector.load %arg8[%c0_56, %c0_57] : memref<8x32xf32, #tpu.memory_space<vmem>>, vector<8x32xf32>
    %141 = arith.truncf %139 : vector<8x16xf32> to vector<8x16xbf16>
    %c48 = arith.constant 48 : index
    %c0_58 = arith.constant 0 : index
    %142 = vector.load %arg5[%c48, %c0_58] : memref<64x32xbf16, #tpu.memory_space<vmem>>, vector<16x32xbf16>
    %cst_59 = arith.constant dense<0.000000e+00> : vector<8x32xf32>
    %143 = tpu.matmul %141, %142, %cst_59 {dimension_numbers = #tpu.dot_dimension_numbers<[1], [0], [0], [1], [0, 0, 1, 1], [], []>} : vector<8x16xbf16>, vector<16x32xbf16>, vector<8x32xf32> -> vector<8x32xf32>
    %144 = arith.addf %140, %143 : vector<8x32xf32>
    %c0_60 = arith.constant 0 : index
    %c0_61 = arith.constant 0 : index
    %145 = vector.load %arg8[%c0_60, %c0_61] : memref<8x32xf32, #tpu.memory_space<vmem>>, vector<8x32xf32>
    tpu.vector_store %arg8[%c0_60, %c0_61], %144 {strides = array<i32>} : memref<8x32xf32, #tpu.memory_space<vmem>>, vector<8x32xf32>,
    %c0_62 = arith.constant 0 : index
    %c0_63 = arith.constant 0 : index
    %146 = vector.load %arg8[%c0_62, %c0_63] : memref<8x32xf32, #tpu.memory_space<vmem>>, vector<8x32xf32>
    %c0_64 = arith.constant 0 : index
    %c0_65 = arith.constant 0 : index
    %c0_66 = arith.constant 0 : index
    %147 = vector.load %arg7[%c0_64, %c0_65, %c0_66] : memref<1x8x32xf32, #tpu.memory_space<vmem>>, vector<1x8x32xf32>
    %148 = vector.shape_cast %147 : vector<1x8x32xf32> to vector<8x32xf32>
    %149 = vector.shape_cast %146 : vector<8x32xf32> to vector<1x8x32xf32>
    tpu.vector_store %arg7[%c0_64, %c0_65, %c0_66], %149 {strides = array<i32>} : memref<1x8x32xf32, #tpu.memory_space<vmem>>, vector<1x8x32xf32>,
    return
  }
  func.func @transform_0(%arg0: i32) -> (i32, i32, i32) {
    %c0_i32 = arith.constant 0 : i32
    %c0_i32_0 = arith.constant 0 : i32
    %c0_i32_1 = arith.constant 0 : i32
    return %arg0, %c0_i32, %c0_i32_0 : i32, i32, i32
  }
  func.func @transform_1(%arg0: i32) -> (i32, i32) {
    %c0_i32 = arith.constant 0 : i32
    %c0_i32_0 = arith.constant 0 : i32
    %c0_i32_1 = arith.constant 0 : i32
    return %c0_i32, %c0_i32_0 : i32, i32
  }
  func.func @transform_2(%arg0: i32) -> (i32, i32) {
    %c0_i32 = arith.constant 0 : i32
    %c0_i32_0 = arith.constant 0 : i32
    %c0_i32_1 = arith.constant 0 : i32
    return %c0_i32, %c0_i32_0 : i32, i32
  }
  func.func @transform_3(%arg0: i32) -> (i32, i32) {
    %c0_i32 = arith.constant 0 : i32
    %c0_i32_0 = arith.constant 0 : i32
    %c0_i32_1 = arith.constant 0 : i32
    return %c0_i32, %c0_i32_0 : i32, i32
  }
  func.func @transform_4(%arg0: i32) -> (i32, i32) {
    %c0_i32 = arith.constant 0 : i32
    %c0_i32_0 = arith.constant 0 : i32
    %c0_i32_1 = arith.constant 0 : i32
    return %c0_i32, %c0_i32_0 : i32, i32
  }
  func.func @transform_5(%arg0: i32) -> (i32, i32) {
    %c0_i32 = arith.constant 0 : i32
    %c0_i32_0 = arith.constant 0 : i32
    %c0_i32_1 = arith.constant 0 : i32
    return %c0_i32, %c0_i32_0 : i32, i32
  }
  func.func @transform_6(%arg0: i32) -> (i32, i32, i32) {
    %c0_i32 = arith.constant 0 : i32
    %c0_i32_0 = arith.constant 0 : i32
    %c0_i32_1 = arith.constant 0 : i32
    return %arg0, %c0_i32, %c0_i32_0 : i32, i32, i32
  }
}

module attributes {stable_mosaic.version = 11 : i64} {
  func.func @attention_kernel(%arg0: i32, %arg1: memref<1x8x32xf32, #tpu.memory_space<vmem>>, %arg2: memref<1x32xf32, #tpu.memory_space<vmem>>, %arg3: memref<1x32xf32, #tpu.memory_space<vmem>>, %arg4: memref<32x192xbf16, #tpu.memory_space<vmem>>, %arg5: memref<64x32xbf16, #tpu.memory_space<vmem>>, %arg6: memref<1x32xf32, #tpu.memory_space<vmem>>, %arg7: memref<1x8x32xf32, #tpu.memory_space<vmem>>, %arg8: memref<8x32xf32, #tpu.memory_space<vmem>>) attributes {dimension_semantics = [#tpu.dimension_semantics<parallel>], iteration_bounds = array<i64: 2>, scalar_prefetch = 0 : i64, scratch_operands = 1 : i64, tpu.core_type = #tpu.core_type<tc>, window_params = [{transform_indices = @transform_0, window_bounds = array<i64: 1, 8, 32>}, {pipeline_mode = #tpu.pipeline_mode<synchronous>, transform_indices = @transform_1, window_bounds = array<i64: 1, 32>}, {pipeline_mode = #tpu.pipeline_mode<synchronous>, transform_indices = @transform_2, window_bounds = array<i64: 1, 32>}, {pipeline_mode = #tpu.pipeline_mode<synchronous>, transform_indices = @transform_3, window_bounds = array<i64: 32, 192>}, {pipeline_mode = #tpu.pipeline_mode<synchronous>, transform_indices = @transform_4, window_bounds = array<i64: 64, 32>}, {pipeline_mode = #tpu.pipeline_mode<synchronous>, transform_indices = @transform_5, window_bounds = array<i64: 1, 32>}, {transform_indices = @transform_6, window_bounds = array<i64: 1, 8, 32>}]} {
    %c0 = arith.constant 0 : index
    %c0_0 = arith.constant 0 : index
    %c0_1 = arith.constant 0 : index
    %0 = vector.load %arg1[%c0, %c0_0, %c0_1] : memref<1x8x32xf32, #tpu.memory_space<vmem>>, vector<1x8x32xf32>
    %1 = vector.shape_cast %0 : vector<1x8x32xf32> to vector<8x32xf32>
    %cst = arith.constant dense<0.000000e+00> : vector<8xf32>
    %2 = vector.multi_reduction <add>, %1, %cst [1] : vector<8x32xf32> to vector<8xf32>
    %3 = vector.shape_cast %2 : vector<8xf32> to vector<8x1xf32>
    %cst_2 = arith.constant 3.200000e+01 : f32
    %4 = vector.broadcast %cst_2 : f32 to vector<8x1xf32>
    %5 = arith.divf %3, %4 : vector<8x1xf32>
    %6 = vector.broadcast %5 : vector<8x1xf32> to vector<8x32xf32>
    %7 = arith.subf %1, %6 : vector<8x32xf32>
    %8 = arith.mulf %7, %7 : vector<8x32xf32>
    %cst_3 = arith.constant dense<0.000000e+00> : vector<8xf32>
    %9 = vector.multi_reduction <add>, %8, %cst_3 [1] : vector<8x32xf32> to vector<8xf32>
    %10 = vector.shape_cast %9 : vector<8xf32> to vector<8x1xf32>
    %cst_4 = arith.constant 3.200000e+01 : f32
    %11 = vector.broadcast %cst_4 : f32 to vector<8x1xf32>
    %12 = arith.divf %10, %11 : vector<8x1xf32>
    %13 = vector.broadcast %5 : vector<8x1xf32> to vector<8x32xf32>
    %14 = arith.subf %1, %13 : vector<8x32xf32>
    %cst_5 = arith.constant 9.99999974E-6 : f32
    %15 = vector.broadcast %cst_5 : f32 to vector<8x1xf32>
    %16 = arith.addf %12, %15 : vector<8x1xf32>
    %17 = math.rsqrt %16 : vector<8x1xf32>
    %18 = vector.broadcast %17 : vector<8x1xf32> to vector<8x32xf32>
    %19 = arith.mulf %14, %18 : vector<8x32xf32>
    %c0_6 = arith.constant 0 : index
    %c0_7 = arith.constant 0 : index
    %20 = vector.load %arg2[%c0_6, %c0_7] : memref<1x32xf32, #tpu.memory_space<vmem>>, vector<1x32xf32>
    %21 = vector.shape_cast %20 : vector<1x32xf32> to vector<32xf32>
    %22 = vector.shape_cast %21 : vector<32xf32> to vector<1x32xf32>
    %23 = vector.broadcast %22 : vector<1x32xf32> to vector<8x32xf32>
    %24 = arith.mulf %19, %23 : vector<8x32xf32>
    %c0_8 = arith.constant 0 : index
    %c0_9 = arith.constant 0 : index
    %25 = vector.load %arg3[%c0_8, %c0_9] : memref<1x32xf32, #tpu.memory_space<vmem>>, vector<1x32xf32>
    %26 = vector.shape_cast %25 : vector<1x32xf32> to vector<32xf32>
    %27 = vector.shape_cast %26 : vector<32xf32> to vector<1x32xf32>
    %28 = vector.broadcast %27 : vector<1x32xf32> to vector<8x32xf32>
    %29 = arith.addf %24, %28 : vector<8x32xf32>
    %30 = arith.truncf %29 : vector<8x32xf32> to vector<8x32xbf16>
    %c0_10 = arith.constant 0 : index
    %c0_11 = arith.constant 0 : index
    %31 = vector.load %arg4[%c0_10, %c0_11] : memref<32x192xbf16, #tpu.memory_space<vmem>>, vector<32x192xbf16>
    %cst_12 = arith.constant dense<0.000000e+00> : vector<8x192xf32>
    %32 = tpu.matmul %30, %31, %cst_12 {dimension_numbers = #tpu.dot_dimension_numbers<[1], [0], [0], [1], [0, 0, 1, 1], [], []>} : vector<8x32xbf16>, vector<32x192xbf16>, vector<8x192xf32> -> vector<8x192xf32>
    %c0_13 = arith.constant 0 : index
    %c0_14 = arith.constant 0 : index
    %33 = vector.load %arg6[%c0_13, %c0_14] : memref<1x32xf32, #tpu.memory_space<vmem>>, vector<1x32xf32>
    %34 = vector.shape_cast %33 : vector<1x32xf32> to vector<32xf32>
    %35 = vector.shape_cast %34 : vector<32xf32> to vector<1x32xf32>
    %36 = vector.broadcast %35 : vector<1x32xf32> to vector<8x32xf32>
    %c0_15 = arith.constant 0 : index
    %c0_16 = arith.constant 0 : index
    %37 = vector.load %arg8[%c0_15, %c0_16] : memref<8x32xf32, #tpu.memory_space<vmem>>, vector<8x32xf32>
    tpu.vector_store %arg8[%c0_15, %c0_16], %36 {strides = array<i32>} : memref<8x32xf32, #tpu.memory_space<vmem>>, vector<8x32xf32>,
    %38 = vector.extract_strided_slice %32 {offsets = [0, 0], sizes = [8, 16], strides = [1, 1]} : vector<8x192xf32> to vector<8x16xf32>
    %cst_17 = arith.constant 2.500000e-01 : f32
    %39 = vector.broadcast %cst_17 : f32 to vector<8x16xf32>
    %40 = arith.mulf %38, %39 : vector<8x16xf32>
    %41 = arith.truncf %40 : vector<8x16xf32> to vector<8x16xbf16>
    %42 = vector.extract_strided_slice %32 {offsets = [0, 64], sizes = [8, 16], strides = [1, 1]} : vector<8x192xf32> to vector<8x16xf32>
    %43 = arith.truncf %42 : vector<8x16xf32> to vector<8x16xbf16>
    %44 = vector.extract_strided_slice %32 {offsets = [0, 128], sizes = [8, 16], strides = [1, 1]} : vector<8x192xf32> to vector<8x16xf32>
    %45 = arith.truncf %44 : vector<8x16xf32> to vector<8x16xbf16>
    %cst_18 = arith.constant dense<0.000000e+00> : vector<8x8xf32>
    %46 = tpu.matmul %41, %43, %cst_18 {dimension_numbers = #tpu.dot_dimension_numbers<[1], [1], [0], [0], [0, 0, 1, 0], [], []>} : vector<8x16xbf16>, vector<8x16xbf16>, vector<8x8xf32> -> vector<8x8xf32>
    %cst_19 = arith.constant dense<0xFF800000> : vector<8xf32>
    %47 = vector.multi_reduction <maximumf>, %46, %cst_19 [1] : vector<8x8xf32> to vector<8xf32>
    %48 = vector.shape_cast %47 : vector<8xf32> to vector<8x1xf32>
    %49 = vector.broadcast %48 : vector<8x1xf32> to vector<8x8xf32>
    %50 = arith.subf %46, %49 : vector<8x8xf32>
    %51 = math.exp %50 : vector<8x8xf32>
    %cst_20 = arith.constant dense<0.000000e+00> : vector<8xf32>
    %52 = vector.multi_reduction <add>, %51, %cst_20 [1] : vector<8x8xf32> to vector<8xf32>
    %53 = vector.shape_cast %52 : vector<8xf32> to vector<8x1xf32>
    %54 = tpu.reciprocal %53 {approx = true} : vector<8x1xf32> -> vector<8x1xf32>
    %55 = vector.broadcast %54 : vector<8x1xf32> to vector<8x8xf32>
    %56 = arith.mulf %51, %55 : vector<8x8xf32>
    %57 = arith.truncf %56 : vector<8x8xf32> to vector<8x8xbf16>
    %cst_21 = arith.constant dense<0.000000e+00> : vector<8x16xf32>
    %58 = tpu.matmul %57, %45, %cst_21 {dimension_numbers = #tpu.dot_dimension_numbers<[1], [0], [0], [1], [0, 0, 1, 1], [], []>} : vector<8x8xbf16>, vector<8x16xbf16>, vector<8x16xf32> -> vector<8x16xf32>
    %c0_22 = arith.constant 0 : index
    %c0_23 = arith.constant 0 : index
    %59 = vector.load %arg8[%c0_22, %c0_23] : memref<8x32xf32, #tpu.memory_space<vmem>>, vector<8x32xf32>
    %60 = arith.truncf %58 : vector<8x16xf32> to vector<8x16xbf16>
    %c0_24 = arith.constant 0 : index
    %c0_25 = arith.constant 0 : index
    %61 = vector.load %arg5[%c0_24, %c0_25] : memref<64x32xbf16, #tpu.memory_space<vmem>>, vector<16x32xbf16>
    %cst_26 = arith.constant dense<0.000000e+00> : vector<8x32xf32>
    %62 = tpu.matmul %60, %61, %cst_26 {dimension_numbers = #tpu.dot_dimension_numbers<[1], [0], [0], [1], [0, 0, 1, 1], [], []>} : vector<8x16xbf16>, vector<16x32xbf16>, vector<8x32xf32> -> vector<8x32xf32>
    %63 = arith.addf %59, %62 : vector<8x32xf32>
    %c0_27 = arith.constant 0 : index
    %c0_28 = arith.constant 0 : index
    %64 = vector.load %arg8[%c0_27, %c0_28] : memref<8x32xf32, #tpu.memory_space<vmem>>, vector<8x32xf32>
    tpu.vector_store %arg8[%c0_27, %c0_28], %63 {strides = array<i32>} : memref<8x32xf32, #tpu.memory_space<vmem>>, vector<8x32xf32>,
    %65 = vector.extract_strided_slice %32 {offsets = [0, 16], sizes = [8, 16], strides = [1, 1]} : vector<8x192xf32> to vector<8x16xf32>
    %cst_29 = arith.constant 2.500000e-01 : f32
    %66 = vector.broadcast %cst_29 : f32 to vector<8x16xf32>
    %67 = arith.mulf %65, %66 : vector<8x16xf32>
    %68 = arith.truncf %67 : vector<8x16xf32> to vector<8x16xbf16>
    %69 = vector.extract_strided_slice %32 {offsets = [0, 80], sizes = [8, 16], strides = [1, 1]} : vector<8x192xf32> to vector<8x16xf32>
    %70 = arith.truncf %69 : vector<8x16xf32> to vector<8x16xbf16>
    %71 = vector.extract_strided_slice %32 {offsets = [0, 144], sizes = [8, 16], strides = [1, 1]} : vector<8x192xf32> to vector<8x16xf32>
    %72 = arith.truncf %71 : vector<8x16xf32> to vector<8x16xbf16>
    %cst_30 = arith.constant dense<0.000000e+00> : vector<8x8xf32>
    %73 = tpu.matmul %68, %70, %cst_30 {dimension_numbers = #tpu.dot_dimension_numbers<[1], [1], [0], [0], [0, 0, 1, 0], [], []>} : vector<8x16xbf16>, vector<8x16xbf16>, vector<8x8xf32> -> vector<8x8xf32>
    %cst_31 = arith.constant dense<0xFF800000> : vector<8xf32>
    %74 = vector.multi_reduction <maximumf>, %73, %cst_31 [1] : vector<8x8xf32> to vector<8xf32>
    %75 = vector.shape_cast %74 : vector<8xf32> to vector<8x1xf32>
    %76 = vector.broadcast %75 : vector<8x1xf32> to vector<8x8xf32>
    %77 = arith.subf %73, %76 : vector<8x8xf32>
    %78 = math.exp %77 : vector<8x8xf32>
    %cst_32 = arith.constant dense<0.000000e+00> : vector<8xf32>
    %79 = vector.multi_reduction <add>, %78, %cst_32 [1] : vector<8x8xf32> to vector<8xf32>
    %80 = vector.shape_cast %79 : vector<8xf32> to vector<8x1xf32>
    %81 = tpu.reciprocal %80 {approx = true} : vector<8x1xf32> -> vector<8x1xf32>
    %82 = vector.broadcast %81 : vector<8x1xf32> to vector<8x8xf32>
    %83 = arith.mulf %78, %82 : vector<8x8xf32>
    %84 = arith.truncf %83 : vector<8x8xf32> to vector<8x8xbf16>
    %cst_33 = arith.constant dense<0.000000e+00> : vector<8x16xf32>
    %85 = tpu.matmul %84, %72, %cst_33 {dimension_numbers = #tpu.dot_dimension_numbers<[1], [0], [0], [1], [0, 0, 1, 1], [], []>} : vector<8x8xbf16>, vector<8x16xbf16>, vector<8x16xf32> -> vector<8x16xf32>
    %c0_34 = arith.constant 0 : index
    %c0_35 = arith.constant 0 : index
    %86 = vector.load %arg8[%c0_34, %c0_35] : memref<8x32xf32, #tpu.memory_space<vmem>>, vector<8x32xf32>
    %87 = arith.truncf %85 : vector<8x16xf32> to vector<8x16xbf16>
    %c16 = arith.constant 16 : index
    %c0_36 = arith.constant 0 : index
    %88 = vector.load %arg5[%c16, %c0_36] : memref<64x32xbf16, #tpu.memory_space<vmem>>, vector<16x32xbf16>
    %cst_37 = arith.constant dense<0.000000e+00> : vector<8x32xf32>
    %89 = tpu.matmul %87, %88, %cst_37 {dimension_numbers = #tpu.dot_dimension_numbers<[1], [0], [0], [1], [0, 0, 1, 1], [], []>} : vector<8x16xbf16>, vector<16x32xbf16>, vector<8x32xf32> -> vector<8x32xf32>
    %90 = arith.addf %86, %89 : vector<8x32xf32>
    %c0_38 = arith.constant 0 : index
    %c0_39 = arith.constant 0 : index
    %91 = vector.load %arg8[%c0_38, %c0_39] : memref<8x32xf32, #tpu.memory_space<vmem>>, vector<8x32xf32>
    tpu.vector_store %arg8[%c0_38, %c0_39], %90 {strides = array<i32>} : memref<8x32xf32, #tpu.memory_space<vmem>>, vector<8x32xf32>,
    %92 = vector.extract_strided_slice %32 {offsets = [0, 32], sizes = [8, 16], strides = [1, 1]} : vector<8x192xf32> to vector<8x16xf32>
    %cst_40 = arith.constant 2.500000e-01 : f32
    %93 = vector.broadcast %cst_40 : f32 to vector<8x16xf32>
    %94 = arith.mulf %92, %93 : vector<8x16xf32>
    %95 = arith.truncf %94 : vector<8x16xf32> to vector<8x16xbf16>
    %96 = vector.extract_strided_slice %32 {offsets = [0, 96], sizes = [8, 16], strides = [1, 1]} : vector<8x192xf32> to vector<8x16xf32>
    %97 = arith.truncf %96 : vector<8x16xf32> to vector<8x16xbf16>
    %98 = vector.extract_strided_slice %32 {offsets = [0, 160], sizes = [8, 16], strides = [1, 1]} : vector<8x192xf32> to vector<8x16xf32>
    %99 = arith.truncf %98 : vector<8x16xf32> to vector<8x16xbf16>
    %cst_41 = arith.constant dense<0.000000e+00> : vector<8x8xf32>
    %100 = tpu.matmul %95, %97, %cst_41 {dimension_numbers = #tpu.dot_dimension_numbers<[1], [1], [0], [0], [0, 0, 1, 0], [], []>} : vector<8x16xbf16>, vector<8x16xbf16>, vector<8x8xf32> -> vector<8x8xf32>
    %cst_42 = arith.constant dense<0xFF800000> : vector<8xf32>
    %101 = vector.multi_reduction <maximumf>, %100, %cst_42 [1] : vector<8x8xf32> to vector<8xf32>
    %102 = vector.shape_cast %101 : vector<8xf32> to vector<8x1xf32>
    %103 = vector.broadcast %102 : vector<8x1xf32> to vector<8x8xf32>
    %104 = arith.subf %100, %103 : vector<8x8xf32>
    %105 = math.exp %104 : vector<8x8xf32>
    %cst_43 = arith.constant dense<0.000000e+00> : vector<8xf32>
    %106 = vector.multi_reduction <add>, %105, %cst_43 [1] : vector<8x8xf32> to vector<8xf32>
    %107 = vector.shape_cast %106 : vector<8xf32> to vector<8x1xf32>
    %108 = tpu.reciprocal %107 {approx = true} : vector<8x1xf32> -> vector<8x1xf32>
    %109 = vector.broadcast %108 : vector<8x1xf32> to vector<8x8xf32>
    %110 = arith.mulf %105, %109 : vector<8x8xf32>
    %111 = arith.truncf %110 : vector<8x8xf32> to vector<8x8xbf16>
    %cst_44 = arith.constant dense<0.000000e+00> : vector<8x16xf32>
    %112 = tpu.matmul %111, %99, %cst_44 {dimension_numbers = #tpu.dot_dimension_numbers<[1], [0], [0], [1], [0, 0, 1, 1], [], []>} : vector<8x8xbf16>, vector<8x16xbf16>, vector<8x16xf32> -> vector<8x16xf32>
    %c0_45 = arith.constant 0 : index
    %c0_46 = arith.constant 0 : index
    %113 = vector.load %arg8[%c0_45, %c0_46] : memref<8x32xf32, #tpu.memory_space<vmem>>, vector<8x32xf32>
    %114 = arith.truncf %112 : vector<8x16xf32> to vector<8x16xbf16>
    %c32 = arith.constant 32 : index
    %c0_47 = arith.constant 0 : index
    %115 = vector.load %arg5[%c32, %c0_47] : memref<64x32xbf16, #tpu.memory_space<vmem>>, vector<16x32xbf16>
    %cst_48 = arith.constant dense<0.000000e+00> : vector<8x32xf32>
    %116 = tpu.matmul %114, %115, %cst_48 {dimension_numbers = #tpu.dot_dimension_numbers<[1], [0], [0], [1], [0, 0, 1, 1], [], []>} : vector<8x16xbf16>, vector<16x32xbf16>, vector<8x32xf32> -> vector<8x32xf32>
    %117 = arith.addf %113, %116 : vector<8x32xf32>
    %c0_49 = arith.constant 0 : index
    %c0_50 = arith.constant 0 : index
    %118 = vector.load %arg8[%c0_49, %c0_50] : memref<8x32xf32, #tpu.memory_space<vmem>>, vector<8x32xf32>
    tpu.vector_store %arg8[%c0_49, %c0_50], %117 {strides = array<i32>} : memref<8x32xf32, #tpu.memory_space<vmem>>, vector<8x32xf32>,
    %119 = vector.extract_strided_slice %32 {offsets = [0, 48], sizes = [8, 16], strides = [1, 1]} : vector<8x192xf32> to vector<8x16xf32>
    %cst_51 = arith.constant 2.500000e-01 : f32
    %120 = vector.broadcast %cst_51 : f32 to vector<8x16xf32>
    %121 = arith.mulf %119, %120 : vector<8x16xf32>
    %122 = arith.truncf %121 : vector<8x16xf32> to vector<8x16xbf16>
    %123 = vector.extract_strided_slice %32 {offsets = [0, 112], sizes = [8, 16], strides = [1, 1]} : vector<8x192xf32> to vector<8x16xf32>
    %124 = arith.truncf %123 : vector<8x16xf32> to vector<8x16xbf16>
    %125 = vector.extract_strided_slice %32 {offsets = [0, 176], sizes = [8, 16], strides = [1, 1]} : vector<8x192xf32> to vector<8x16xf32>
    %126 = arith.truncf %125 : vector<8x16xf32> to vector<8x16xbf16>
    %cst_52 = arith.constant dense<0.000000e+00> : vector<8x8xf32>
    %127 = tpu.matmul %122, %124, %cst_52 {dimension_numbers = #tpu.dot_dimension_numbers<[1], [1], [0], [0], [0, 0, 1, 0], [], []>} : vector<8x16xbf16>, vector<8x16xbf16>, vector<8x8xf32> -> vector<8x8xf32>
    %cst_53 = arith.constant dense<0xFF800000> : vector<8xf32>
    %128 = vector.multi_reduction <maximumf>, %127, %cst_53 [1] : vector<8x8xf32> to vector<8xf32>
    %129 = vector.shape_cast %128 : vector<8xf32> to vector<8x1xf32>
    %130 = vector.broadcast %129 : vector<8x1xf32> to vector<8x8xf32>
    %131 = arith.subf %127, %130 : vector<8x8xf32>
    %132 = math.exp %131 : vector<8x8xf32>
    %cst_54 = arith.constant dense<0.000000e+00> : vector<8xf32>
    %133 = vector.multi_reduction <add>, %132, %cst_54 [1] : vector<8x8xf32> to vector<8xf32>
    %134 = vector.shape_cast %133 : vector<8xf32> to vector<8x1xf32>
    %135 = tpu.reciprocal %134 {approx = true} : vector<8x1xf32> -> vector<8x1xf32>
    %136 = vector.broadcast %135 : vector<8x1xf32> to vector<8x8xf32>
    %137 = arith.mulf %132, %136 : vector<8x8xf32>
    %138 = arith.truncf %137 : vector<8x8xf32> to vector<8x8xbf16>
    %cst_55 = arith.constant dense<0.000000e+00> : vector<8x16xf32>
    %139 = tpu.matmul %138, %126, %cst_55 {dimension_numbers = #tpu.dot_dimension_numbers<[1], [0], [0], [1], [0, 0, 1, 1], [], []>} : vector<8x8xbf16>, vector<8x16xbf16>, vector<8x16xf32> -> vector<8x16xf32>
    %c0_56 = arith.constant 0 : index
    %c0_57 = arith.constant 0 : index
    %140 = vector.load %arg8[%c0_56, %c0_57] : memref<8x32xf32, #tpu.memory_space<vmem>>, vector<8x32xf32>
    %141 = arith.truncf %139 : vector<8x16xf32> to vector<8x16xbf16>
    %c48 = arith.constant 48 : index
    %c0_58 = arith.constant 0 : index
    %142 = vector.load %arg5[%c48, %c0_58] : memref<64x32xbf16, #tpu.memory_space<vmem>>, vector<16x32xbf16>
    %cst_59 = arith.constant dense<0.000000e+00> : vector<8x32xf32>
    %143 = tpu.matmul %141, %142, %cst_59 {dimension_numbers = #tpu.dot_dimension_numbers<[1], [0], [0], [1], [0, 0, 1, 1], [], []>} : vector<8x16xbf16>, vector<16x32xbf16>, vector<8x32xf32> -> vector<8x32xf32>
    %144 = arith.addf %140, %143 : vector<8x32xf32>
    %c0_60 = arith.constant 0 : index
    %c0_61 = arith.constant 0 : index
    %145 = vector.load %arg8[%c0_60, %c0_61] : memref<8x32xf32, #tpu.memory_space<vmem>>, vector<8x32xf32>
    tpu.vector_store %arg8[%c0_60, %c0_61], %144 {strides = array<i32>} : memref<8x32xf32, #tpu.memory_space<vmem>>, vector<8x32xf32>,
    %c0_62 = arith.constant 0 : index
    %c0_63 = arith.constant 0 : index
    %146 = vector.load %arg8[%c0_62, %c0_63] : memref<8x32xf32, #tpu.memory_space<vmem>>, vector<8x32xf32>
    %c0_64 = arith.constant 0 : index
    %c0_65 = arith.constant 0 : index
    %c0_66 = arith.constant 0 : index
    %147 = vector.load %arg7[%c0_64, %c0_65, %c0_66] : memref<1x8x32xf32, #tpu.memory_space<vmem>>, vector<1x8x32xf32>
    %148 = vector.shape_cast %147 : vector<1x8x32xf32> to vector<8x32xf32>
    %149 = vector.shape_cast %146 : vector<8x32xf32> to vector<1x8x32xf32>
    tpu.vector_store %arg7[%c0_64, %c0_65, %c0_66], %149 {strides = array<i32>} : memref<1x8x32xf32, #tpu.memory_space<vmem>>, vector<1x8x32xf32>,
    return
  }
  func.func @transform_0(%arg0: i32) -> (i32, i32, i32) {
    %c0_i32 = arith.constant 0 : i32
    %c0_i32_0 = arith.constant 0 : i32
    %c0_i32_1 = arith.constant 0 : i32
    return %arg0, %c0_i32, %c0_i32_0 : i32, i32, i32
  }
  func.func @transform_1(%arg0: i32) -> (i32, i32) {
    %c0_i32 = arith.constant 0 : i32
    %c0_i32_0 = arith.constant 0 : i32
    %c0_i32_1 = arith.constant 0 : i32
    return %c0_i32, %c0_i32_0 : i32, i32
  }
  func.func @transform_2(%arg0: i32) -> (i32, i32) {
    %c0_i32 = arith.constant 0 : i32
    %c0_i32_0 = arith.constant 0 : i32
    %c0_i32_1 = arith.constant 0 : i32
    return %c0_i32, %c0_i32_0 : i32, i32
  }
  func.func @transform_3(%arg0: i32) -> (i32, i32) {
    %c0_i32 = arith.constant 0 : i32
    %c0_i32_0 = arith.constant 0 : i32
    %c0_i32_1 = arith.constant 0 : i32
    return %c0_i32, %c0_i32_0 : i32, i32
  }
  func.func @transform_4(%arg0: i32) -> (i32, i32) {
    %c0_i32 = arith.constant 0 : i32
    %c0_i32_0 = arith.constant 0 : i32
    %c0_i32_1 = arith.constant 0 : i32
    return %c0_i32, %c0_i32_0 : i32, i32
  }
  func.func @transform_5(%arg0: i32) -> (i32, i32) {
    %c0_i32 = arith.constant 0 : i32
    %c0_i32_0 = arith.constant 0 : i32
    %c0_i32_1 = arith.constant 0 : i32
    return %c0_i32, %c0_i32_0 : i32, i32
  }
  func.func @transform_6(%arg0: i32) -> (i32, i32, i32) {
    %c0_i32 = arith.constant 0 : i32
    %c0_i32_0 = arith.constant 0 : i32
    %c0_i32_1 = arith.constant 0 : i32
    return %arg0, %c0_i32, %c0_i32_0 : i32, i32, i32
  }
}

</mosaic_0001>

<bundles_post_ra>
// kernel: tpu_custom_call.1
= control target key start
LH: loop header
LB: loop body
LE: loop exit
PB: predicated region body
PF: predicated region fallthrough
CT: control target
= control target key end

     0   :  { %11 = vsyncpa [#allocation4], 0  ;;  %s1634_s0 = inlined_call_operand.vmem [shape: f32[2,8,32], index: 0, kind: input, shape index: {}]   ;;  %s1635_s1 = inlined_call_operand.vmem [shape: f32[1,32], index: 1, kind: input, shape index: {}]   ;;  %s1636_s2 = inlined_call_operand.vmem [shape: f32[1,32], index: 2, kind: input, shape index: {}]   ;;  %s1637_s3 = inlined_call_operand.vmem [shape: bf16[32,192], index: 3, kind: input, shape index: {}]   ;;  %s1638_s4 = inlined_call_operand.vmem [shape: bf16[64,32], index: 4, kind: input, shape index: {}]   ;;  %s1639_s5 = inlined_call_operand.vmem [shape: f32[1,32], index: 5, kind: input, shape index: {}]   ;;  %s1640_s6 = inlined_call_operand.hbm [shape: f32[2,8,32], index: 6, kind: output, shape index: {}]  }
   0x1   :  { %13 = vsyncpa [#allocation4 + $0x1], 0  ;;  %s1413_s21 = smov 0   ;;  %s1415_s22 = smov 0  }
   0x2   :  { %s1417_s23 = smov 0   ;;  %s1419_s24 = smov 0  }
   0x3 LB: > { %s1434_s25 = sadd.s32 4294967295, %s1365_s24   ;;  %s1098_s26 = sadd.s32 4294967294, %s1365_s24   ;;  %s1365_s24 = sphi %s1419_s24, %s1646_s24   ;;  %s1361_s23 = sphi %s1417_s23, %s1645_s23   ;;  %s1357_s22 = sphi %s1415_s22, %s1644_s22   ;;  %s1353_s21 = sphi %s1413_s21, %s1643_s21  }
   0x4   : > { %s1438_s27 = sadd.s32 1, %s1365_s24   ;;  %s157_s28 = sadd.s32 1, %s1361_s23 }
   0x5   : > { %s154_s29 = ssub.s32 %s1365_s24, %s1438_s27  ;;  %p167_p0 = scmp.ne.s32.totalorder %s1361_s23, %s1357_s22 }
   0x6   : > { %p155_p1 = scmp.eq.s32.totalorder %s154_s29, 0  ;;  %p168_p2 = scmp.eq.s32.totalorder %s1434_s25, 1 }
   0x7   : > { %p173_p3 = scmp.ne.s32.totalorder %s1357_s22, %s1353_s21  ;;  %p174_p4 = scmp.eq.s32.totalorder %s1098_s26, 1 }
   0x8   : > { %s1449_s30 = scalar_select %p155_p1, %s1361_s23, %s157_s28  }
   0x9   : > { %p1451_p5 = por %p168_p2, %p167_p0  ;;  %p1455_p6 = por %p174_p4, %p173_p3 }
   0xa   : > { %p1101_p7 = scmp.ge.s32.totalorder %s1365_s24, 1  ;;  %p214_p8 = scmp.lt.s32.totalorder %s1365_s24, 3 }
   0xc   : > { %p215_p9 = pnand %p1101_p7, %p214_p8 }
   0xd   : > { %p243_p10 = scmp.lt.s32.totalorder (!%p215_p9), %s1434_s25, 1  ;;  %s1370_s11 = smov (!%p215_p9), 64  }
   0xe   : > { %218 = sbr.rel (%p215_p9) target bundleno = 3115 (0xc2b), region = 44  ;;  %s1371_s12 = smov (!%p215_p9), 112  }
   0xf   : > { %s1373_s18 = smov (!%p215_p9), 32   ;;  %s1374_s19 = smov (!%p215_p9), 96  }
  0x10   : > { %s1375_s28 = smov (!%p215_p9), 16   ;;  %s1376_s29 = smov (!%p215_p9), 80  }
  0x11   : > { %s1129_s15 = sshll.u32 (!%p215_p9), %s1434_s25, 7 }
  0x12   : > { %s1598_s20 = scalar_lea.hbm (!%p215_p9), %s1640_s6, %s1129_s15 }
  0x13   : > { %s244_s9 = scalar_select %p243_p10, %s1434_s25, 1  ;;  %vm249_vm0 = vcmask 261120   ;;  %v1277_v7 = vld [vmem:[%s1637_s3 + $0x14] ss:$8 sps:$4 sm:$0xff]   ;;  %v1279_v8 = vld [vmem:[%s1637_s3 + $0x10] ss:$8 sps:$4 sm:$0xff]  }
  0x14   : > { %v1280_v9 = vld [vmem:[%s1637_s3 + $0x4] ss:$8 sps:$4 sm:$0xff]   ;;  %320 = vmatprep.subr.bf16.mxu0 %v1277_v7  ;;  %v1367_v10 = vmov 0   ;;  %v1282_v11 = vld [vmem:[%s1637_s3] ss:$8 sps:$4 sm:$0xff]   ;;  %v1368_v22 = vmov 0.0  }
  0x15   : > { %s1103_s10 = sshll.u32 %s244_s9, 3  ;;  %340 = vmatprep.mubr.bf16.mxu0 %v1367_v10  ;;  %321 = vmatpush1.bf16.msra.mxu0 %v1279_v8  ;;  %v1104_v16 = vld [vmem:[%s1635_s1] ss:$0 sm:$0xff]  ;;  %vm1369_vm1 = vmmov 0   ;;  %vm427_vm2 = vcmask 1043456   ;;  %vm364_vm3 = vcmask 130048  }
  0x16   : > { %s246_s13 = scalar_lea.vmem %s1634_s0, %s1103_s10  ;;  %322 = vmatprep.subr.bf16.mxu0 %v1280_v9  ;;  %v1105_v18 = vld [vmem:[%s1636_s2] ss:$0 sm:$0xff]  ;;  %1156 = vmatprep.subr.bf16.mxu1 %v1368_v22  ;;  %vm411_vm4 = vcmask 64512  }
  0x17   : > { %v248_v0 = vld [vmem:[%s246_s13] sm:$0xff]  ;;  %1158 = vmatprep.mubr.msk.bf16.mxu1 %vm1369_vm1, %v1368_v22  ;;  %s1372_s13 = smov 48  }
  0x18   : > { %v250_v1 = vsel %vm249_vm0, %v248_v0, 0.0  ;;  %v1283_v44 = vld [vmem:[%s1638_s4] sm:$0xff]  }
  0x19   : > { %251 = vadd.xlane.f32.xlu0 %v250_v1  ;;  %323 = vmatpush1.bf16.msra.mxu0 %v1282_v11 }
  0x1a   : > { %1162 = vmatprep.subr.bf16.mxu0 %v1368_v22 }
  0xa2   : > { %v252_v2 = vpop.xlane.xlu0 %251 }
  0xa3   : > { %v254_v3 = vmul.f32 0.03125, %v252_v2 }
  0xa5   : > { %v255_v4 = vsub.f32 %v248_v0, %v254_v3  ;;  %v1111_v0 = vld [vmem:[%s1639_s5] ss:$0 sm:$0xff] }
  0xa6   : > { %356 = vst.msk [vmem:[#allocation2] sm:$0xff] %vm249_vm0, %v1111_v0 }
  0xa7   : > { %v256_v5 = vmul.f32 %v255_v4, %v255_v4 }
  0xa9   : > { %v257_v6 = vsel %vm249_vm0, %v256_v5, 0.0 }
  0xaa   : > { %258 = vadd.xlane.f32.xlu0 %v257_v6 }
  0xad   : > { %v471_v6 = vld [vmem:[#allocation2] sm:$0xff] }
 0x133   : > { %v259_v12 = vpop.xlane.xlu0 %258 }
 0x134   : > { %v260_v13 = vmul.f32 0.03125, %v259_v12 }
 0x136   : > { %v261_v14 = vadd.f32 1e-05, %v260_v13 }
 0x138   : > { %1287 = vrsqrt.f32 %v261_v14 }
 0x145   : > { %v1288_v15 = vpop.eup %1287 }
 0x146   : > { %v263_v17 = vmul.f32 %v1288_v15, %v255_v4 }
 0x148   : > { %v271_v19 = vmul.f32 %v1104_v16, %v263_v17 }
 0x14a   : > { %v279_v20 = vadd.f32 %v1105_v18, %v271_v19  ;;  %v1284_v19 = vld [vmem:[%s1638_s4 + $0x8] sm:$0xff]  }
 0x14c   : > { %v280_v21 = vpack.c.bf16 %v279_v20, %v279_v20 }
 0x14e   : > { %1110 = vmatmul.mubr.msk.bf16.vlgmr.msra.gmra.mxu0 %vm249_vm0, %v280_v21 }
 0x14f   : > { %1164 = vmatprep.mubr.msk.bf16.mxu0 %vm1369_vm1, %v1368_v22 }
 0x20e   : > { %v342_v23 = vpop.f32.mrf.mxu0 }
 0x20f   : > { %v1493_v24 = vpack.c.bf16 %v342_v23, %v342_v23  ;;  %v357_v32 = vmul.f32 0.25, %v342_v23 }
 0x210   : > { %v344_v25 = vpop.f32.mrf.mxu0 }
 0x211   : > { %v1495_v26 = vpack.c.bf16 %v344_v25, %v344_v25  ;;  %362 = vrot.lane.b32.xlu1 %v1493_v24, %s1370_s11  ;;  %v1503_v33 = vpack.c.bf16 %v357_v32, %v357_v32 }
 0x212   : > { %v346_v27 = vpop.f32.mrf.mxu0 }
 0x213   : > { %v429_v28 = vsel %vm427_vm2, %v1495_v26, 0 }
 0x214   : > { %v347_v29 = vpop.f32.mrf.mxu0  ;;  %1163 = vmatpush3.bf16.msra.mxu0 %v429_v28 }
 0x215   : > { %1174 = vmatprep.subr.bf16.mxu0 %v1368_v22 }
 0x283   : > { %v363_v30 = vpop.permute.xlu1 %362 }
 0x284   : > { %v369_v31 = vsel %vm364_vm3, %v363_v30, 0 }
 0x285   : > { %1157 = vmatpush3.bf16.xpose.msra.mxu1 %v369_v31 }
 0x286   : > { %1168 = vmatprep.subr.bf16.mxu1 %v1368_v22 }
 0x28c   : > { %1159 = vmatmul.mubr.msk.bf16.vlgmr.msra.gmra.mxu1 %vm364_vm3, %v1503_v33 }
 0x28d   : > { %1170 = vmatprep.mubr.msk.bf16.mxu1 %vm1369_vm1, %v1368_v22  ;;  %1169 = vmatpush3.bf16.msra.mxu1 %v1283_v44 }
 0x28e   : > { %1180 = vmatprep.subr.bf16.mxu1 %v1368_v22 }
 0x34c   : > { %v405_v34 = vpop.f32.mrf.mxu1 }
 0x34d   : > { %v412_v35 = vsel %vm411_vm4, %v405_v34, -inf }
 0x34e   : > { %413 = vmax.xlane.f32.xlu1 %v412_v35  ;;  %v1160_v36 = vpop.f32.mrf.mxu1 }
 0x350   : > { %v408_v37 = vpop.f32.mrf.mxu1 }
 0x352   : > { %v1161_v38 = vpop.f32.mrf.mxu1 }
 0x35f   : > { %590 = vrot.lane.b32.xlu1 %v1495_v26, %s1371_s12 }
 0x3d7   : > { %v414_v39 = vpop.xlane.xlu1 %413 }
 0x3d8   : > { %v415_v40 = vsub.f32 %v405_v34, %v414_v39 }
 0x3da   : > { %v416_v41 = vmul.f32 1.442695, %v415_v40 }
 0x3db   : > { %v591_v52 = vpop.permute.xlu1 %590 }
 0x3dc   : > { %1289 = vpow2.f32 %v416_v41  ;;  %v596_v56 = vsel %vm427_vm2, %v591_v52, 0  ;;  %v1285_v52 = vld [vmem:[%s1638_s4 + $0x10] sm:$0xff]  }
 0x3e9   : > { %v1290_v42 = vpop.eup %1289 }
 0x3ea   : > { %v418_v43 = vsel %vm411_vm4, %v1290_v42, 0.0 }
 0x3eb   : > { %419 = vadd.xlane.f32.xlu0 %v418_v43 }
 0x401   : > { %529 = vrot.lane.b32.xlu0 %v1493_v24, %s1372_s13  ;;  %s240_s13 = sand.u32 1, %s1357_s22  }
 0x402   : > { %s1102_s14 = sshll.u32 %s240_s13, 3  ;;  %s1026_s26 = scalar_lea.sflag [#allocation4], %s240_s13 }
 0x403   : > { %s242_s16 = scalar_lea.vmem [#allocation3], %s1102_s14 }
 0x404   : > { %s1039_s17 = sshll.u32 %s242_s16, 4  ;;  %s1040_s17 = int_to_ptr.vmem [resolvable:$true] %s1039_s17 }
 0x405   : > { %527 = vrot.lane.b32.xlu0 %v1503_v33, %s1371_s12 }
 0x474   : > { %v420_v45 = vpop.xlane.xlu0 %419 }
 0x475   : > { %1291 = vrcp.f32 %v420_v45 }
 0x478   : > { %v530_v48 = vpop.permute.xlu0 %529 }
 0x479   : > { %v535_v50 = vsel %vm364_vm3, %v530_v48, 0 }
 0x47c   : > { %v528_v51 = vpop.permute.xlu0 %527 }
 0x482   : > { %v1292_v46 = vpop.eup %1291 }
 0x483   : > { %v422_v47 = vmul.f32 %v1292_v46, %v1290_v42 }
 0x485   : > { %v423_v49 = vpack.c.bf16 %v422_v47, %v422_v47 }
 0x487   : > { %1165 = vmatmul.mubr.msk.bf16.vlgmr.msra.gmra.mxu0 %vm411_vm4, %v423_v49 }
 0x488   : > { %1175 = vmatpush3.bf16.xpose.msra.mxu0 %v535_v50  ;;  %1176 = vmatprep.mubr.msk.bf16.mxu0 %vm1369_vm1, %v1368_v22 }
 0x489   : > { %1186 = vmatprep.subr.bf16.mxu0 %v1368_v22 }
 0x48f   : > { %1177 = vmatmul.mubr.msk.bf16.vlgmr.msra.gmra.mxu0 %vm364_vm3, %v528_v51 }
 0x490   : > { %1188 = vmatprep.mubr.msk.bf16.mxu0 %vm1369_vm1, %v1368_v22  ;;  %1187 = vmatpush3.bf16.msra.mxu0 %v1284_v19 }
 0x491   : > { %1198 = vmatprep.subr.bf16.mxu0 %v1368_v22 }
 0x547   : > { %v465_v53 = vpop.f32.mrf.mxu0 }
 0x548   : > { %v472_v54 = vpack.c.bf16 %v465_v53, %v465_v53 }
 0x549   : > { %v1166_v55 = vpop.f32.mrf.mxu0 }
 0x54a   : > { %1171 = vmatmul.mubr.msk.bf16.vlgmr.msra.gmra.mxu1 %vm364_vm3, %v472_v54 }
 0x54b   : > { %1181 = vmatpush3.bf16.msra.mxu1 %v596_v56  ;;  %v468_v57 = vpop.f32.mrf.mxu0  ;;  %1182 = vmatprep.mubr.msk.bf16.mxu1 %vm1369_vm1, %v1368_v22 }
 0x54c   : > { %1192 = vmatprep.subr.bf16.mxu1 %v1368_v22 }
 0x54d   : > { %v1167_v58 = vpop.f32.mrf.mxu0 }
 0x54f   : > { %v571_v59 = vpop.f32.mrf.mxu0 }
 0x550   : > { %v577_v60 = vsel %vm411_vm4, %v571_v59, -inf }
 0x551   : > { %578 = vmax.xlane.f32.xlu0 %v577_v60  ;;  %v1178_v61 = vpop.f32.mrf.mxu0 }
 0x553   : > { %v574_v62 = vpop.f32.mrf.mxu0 }
 0x555   : > { %v1179_v63 = vpop.f32.mrf.mxu0 }
 0x5da   : > { %v579_v1 = vpop.xlane.xlu0 %578 }
 0x5db   : > { %v580_v2 = vsub.f32 %v571_v59, %v579_v1 }
 0x5dd   : > { %v581_v3 = vmul.f32 1.442695, %v580_v2 }
 0x5df   : > { %1293 = vpow2.f32 %v581_v3 }
 0x5ec   : > { %v1294_v4 = vpop.eup %1293 }
 0x5ed   : > { %v583_v5 = vsel %vm411_vm4, %v1294_v4, 0.0 }
 0x5ee   : > { %584 = vadd.xlane.f32.xlu1 %v583_v5  ;;  %v1286_v5 = vld [vmem:[%s1638_s4 + $0x18] sm:$0xff]  }
 0x5ff   : > { %695 = vrot.lane.b32.xlu1 %v1493_v24, %s1373_s18 }
 0x603   : > { %693 = vrot.lane.b32.xlu1 %v1503_v33, %s1374_s19 }
 0x60a   : > { %v518_v7 = vpop.f32.mrf.mxu1 }
 0x60b   : > { %v524_v8 = vadd.f32 %v518_v7, %v471_v6 }
 0x60c   : > { %v1172_v9 = vpop.f32.mrf.mxu1 }
 0x60d   : > { %525 = vst.msk [vmem:[#allocation2] sm:$0xff] %vm249_vm0, %v524_v8 }
 0x60e   : > { %v521_v10 = vpop.f32.mrf.mxu1 }
 0x610   : > { %v1173_v11 = vpop.f32.mrf.mxu1 }
 0x614   : > { %v638_v41 = vld [vmem:[#allocation2] sm:$0xff] }
 0x677   : > { %v585_v12 = vpop.xlane.xlu1 %584 }
 0x678   : > { %1295 = vrcp.f32 %v585_v12 }
 0x67b   : > { %v696_v15 = vpop.permute.xlu1 %695 }
 0x67c   : > { %v701_v17 = vsel %vm364_vm3, %v696_v15, 0 }
 0x67f   : > { %v694_v18 = vpop.permute.xlu1 %693 }
 0x685   : > { %v1296_v13 = vpop.eup %1295 }
 0x686   : > { %v587_v14 = vmul.f32 %v1296_v13, %v1294_v4 }
 0x688   : > { %v588_v16 = vpack.c.bf16 %v587_v14, %v587_v14 }
 0x68a   : > { %1183 = vmatmul.mubr.msk.bf16.vlgmr.msra.gmra.mxu1 %vm411_vm4, %v588_v16 }
 0x68b   : > { %1193 = vmatpush3.bf16.xpose.msra.mxu1 %v701_v17  ;;  %1194 = vmatprep.mubr.msk.bf16.mxu1 %vm1369_vm1, %v1368_v22 }
 0x68c   : > { %1204 = vmatprep.subr.bf16.mxu1 %v1368_v22 }
 0x692   : > { %1195 = vmatmul.mubr.msk.bf16.vlgmr.msra.gmra.mxu1 %vm364_vm3, %v694_v18 }
 0x693   : > { %1206 = vmatprep.mubr.msk.bf16.mxu1 %vm1369_vm1, %v1368_v22  ;;  %1205 = vmatpush3.bf16.msra.mxu1 %v1285_v52 }
 0x694   : > { %1216 = vmatprep.subr.bf16.mxu1 %v1368_v22 }
 0x74a   : > { %v632_v20 = vpop.f32.mrf.mxu1 }
 0x74b   : > { %v639_v21 = vpack.c.bf16 %v632_v20, %v632_v20 }
 0x74c   : > { %v1184_v23 = vpop.f32.mrf.mxu1 }
 0x74d   : > { %1189 = vmatmul.mubr.msk.bf16.vlgmr.msra.gmra.mxu0 %vm364_vm3, %v639_v21 }
 0x74e   : > { %v635_v25 = vpop.f32.mrf.mxu1  ;;  %1200 = vmatprep.mubr.msk.bf16.mxu0 %vm1369_vm1, %v1368_v22 }
 0x750   : > { %v1185_v27 = vpop.f32.mrf.mxu1 }
 0x752   : > { %v737_v28 = vpop.f32.mrf.mxu1 }
 0x753   : > { %v743_v29 = vsel %vm411_vm4, %v737_v28, -inf }
 0x754   : > { %744 = vmax.xlane.f32.xlu0 %v743_v29  ;;  %v1196_v30 = vpop.f32.mrf.mxu1 }
 0x756   : > { %v740_v31 = vpop.f32.mrf.mxu1 }
 0x758   : > { %v1197_v32 = vpop.f32.mrf.mxu1 }
 0x76a   : > { %755 = vrot.lane.b32.xlu0 %v1495_v26, %s1374_s19 }
 0x76e   : > { %860 = vrot.lane.b32.xlu0 %v1493_v24, %s1375_s28  ;;  %s1305_s28 = scalar_lea.vmem %s1040_s17, 128 }
 0x76f   : > { %p1306_p11 = scmp.ne.s32.totalorder %s1040_s17, %s1305_s28 }
 0x771   : > { %p1307_p12 = pnand %p1306_p11, %p1451_p5 }
 0x772   : > { %858 = vrot.lane.b32.xlu0 %v1503_v33, %s1376_s29 }
 0x773   : > { %p1308_p13 = pneg %p1307_p12 }
 0x7dd   : > { %v745_v34 = vpop.xlane.xlu0 %744 }
 0x7de   : > { %v746_v35 = vsub.f32 %v737_v28, %v745_v34 }
 0x7e0   : > { %v747_v36 = vmul.f32 1.442695, %v746_v35 }
 0x7e1   : > { %v756_v37 = vpop.permute.xlu0 %755 }
 0x7e2   : > { %1297 = vpow2.f32 %v747_v36  ;;  %v761_v38 = vsel %vm427_vm2, %v756_v37, 0 }
 0x7e3   : > { %1199 = vmatpush3.bf16.msra.mxu0 %v761_v38 }
 0x7e4   : > { %1210 = vmatprep.subr.bf16.mxu0 %v1368_v22 }
 0x7e5   : > { %v861_v48 = vpop.permute.xlu0 %860 }
 0x7e6   : > { %v866_v50 = vsel %vm364_vm3, %v861_v48, 0 }
 0x7e9   : > { %v859_v51 = vpop.permute.xlu0 %858 }
 0x7ef   : > { %v1298_v39 = vpop.eup %1297 }
 0x7f0   : > { %v749_v40 = vsel %vm411_vm4, %v1298_v39, 0.0 }
 0x7f1   : > { %750 = vadd.xlane.f32.xlu1 %v749_v40 }
 0x80d   : > { %v685_v24 = vpop.f32.mrf.mxu0 }
 0x80e   : > { %v691_v42 = vadd.f32 %v685_v24, %v638_v41 }
 0x80f   : > { %v1190_v43 = vpop.f32.mrf.mxu0 }
 0x810   : > { %692 = vst.msk [vmem:[#allocation2] sm:$0xff] %vm249_vm0, %v691_v42 }
 0x811   : > { %v688_v33 = vpop.f32.mrf.mxu0 }
 0x813   : > { %v1191_v44 = vpop.f32.mrf.mxu0 }
 0x87a   : > { %v751_v45 = vpop.xlane.xlu1 %750 }
 0x87b   : > { %1299 = vrcp.f32 %v751_v45 }
 0x888   : > { %v1300_v46 = vpop.eup %1299 }
 0x889   : > { %v753_v47 = vmul.f32 %v1300_v46, %v1298_v39 }
 0x88b   : > { %v754_v49 = vpack.c.bf16 %v753_v47, %v753_v47 }
 0x88d   : > { %1201 = vmatmul.mubr.msk.bf16.vlgmr.msra.gmra.mxu0 %vm411_vm4, %v754_v49 }
 0x88e   : > { %1211 = vmatpush3.bf16.xpose.msra.mxu0 %v866_v50  ;;  %1212 = vmatprep.mubr.msk.bf16.mxu0 %vm1369_vm1, %v1368_v22 }
 0x88f   : > { %1222 = vmatprep.subr.bf16.mxu0 %v1368_v22 }
 0x895   : > { %1213 = vmatmul.mubr.msk.bf16.vlgmr.msra.gmra.mxu0 %vm364_vm3, %v859_v51 }
 0x896   : > { %1224 = vmatprep.mubr.msk.bf16.mxu0 %vm1369_vm1, %v1368_v22  ;;  %1223 = vmatpush3.bf16.msra.mxu0 %v1286_v5 }
 0x94d   : > { %v797_v53 = vpop.f32.mrf.mxu0 }
 0x94e   : > { %v804_v54 = vpack.c.bf16 %v797_v53, %v797_v53 }
 0x94f   : > { %v1202_v55 = vpop.f32.mrf.mxu0 }
 0x950   : > { %1207 = vmatmul.mubr.msk.bf16.vlgmr.msra.gmra.mxu1 %vm364_vm3, %v804_v54 }
 0x951   : > { %v800_v56 = vpop.f32.mrf.mxu0  ;;  %1218 = vmatprep.mubr.msk.bf16.mxu1 %vm1369_vm1, %v1368_v22  ;;  %v803_v22 = vld [vmem:[#allocation2] sm:$0xff] }
 0x953   : > { %v1203_v57 = vpop.f32.mrf.mxu0 }
 0x955   : > { %v902_v58 = vpop.f32.mrf.mxu0 }
 0x956   : > { %v908_v59 = vsel %vm411_vm4, %v902_v58, -inf }
 0x957   : > { %909 = vmax.xlane.f32.xlu0 %v908_v59  ;;  %v1214_v60 = vpop.f32.mrf.mxu0 }
 0x959   : > { %v905_v61 = vpop.f32.mrf.mxu0 }
 0x95b   : > { %v1215_v62 = vpop.f32.mrf.mxu0 }
 0x9e0   : > { %v910_v63 = vpop.xlane.xlu0 %909 }
 0x9e1   : > { %v911_v0 = vsub.f32 %v902_v58, %v910_v63 }
 0x9e3   : > { %v912_v1 = vmul.f32 1.442695, %v911_v0 }
 0x9e5   : > { %1301 = vpow2.f32 %v912_v1 }
 0x9f2   : > { %v1302_v2 = vpop.eup %1301 }
 0x9f3   : > { %v914_v3 = vsel %vm411_vm4, %v1302_v2, 0.0 }
 0x9f4   : > { %915 = vadd.xlane.f32.xlu1 %v914_v3 }
 0xa05   : > { %920 = vrot.lane.b32.xlu1 %v1495_v26, %s1376_s29  ;;  %s1377_s29 = smov [#allocation3]  }
 0xa06   : > { %s1309_s9 = sshll.u32 %s1377_s29, 4  ;;  %s1310_s9 = int_to_ptr.vmem [resolvable:$false] %s1309_s9 }
 0xa07   : > { %s1311_s25 = scalar_lea.vmem %s1310_s9, 256  ;;  %p1312_p0 = scmp.lt.s32.totalorder %s1040_s17, %s1310_s9 }
 0xa08   : > { %p1313_p1 = scmp.lt.s32.totalorder %s1311_s25, %s1305_s28 }
 0xa0a   : > { %p1314_p2 = por %p1313_p1, %p1312_p0 }
 0xa0c   : > { %p1315_p3 = pnand %p1314_p2, %p1308_p13 }
 0xa10   : > { %v850_v4 = vpop.f32.mrf.mxu1 }
 0xa11   : > { %v856_v6 = vadd.f32 %v850_v4, %v803_v22 }
 0xa12   : > { %v1208_v7 = vpop.f32.mrf.mxu1 }
 0xa13   : > { %857 = vst.msk [vmem:[#allocation2] sm:$0xff] %vm249_vm0, %v856_v6 }
 0xa14   : > { %v853_v8 = vpop.f32.mrf.mxu1 }
 0xa16   : > { %v1209_v9 = vpop.f32.mrf.mxu1 }
 0xa1a   : > { %v968_v20 = vld [vmem:[#allocation2] sm:$0xff] }
 0xa7d   : > { %v916_v10 = vpop.xlane.xlu1 %915 }
 0xa7e   : > { %1303 = vrcp.f32 %v916_v10 }
 0xa81   : > { %v921_v11 = vpop.permute.xlu1 %920 }
 0xa82   : > { %v926_v12 = vsel %vm427_vm2, %v921_v11, 0 }
 0xa83   : > { %1217 = vmatpush3.bf16.msra.mxu1 %v926_v12 }
 0xa8b   : > { %v1304_v26 = vpop.eup %1303 }
 0xa8c   : > { %v918_v13 = vmul.f32 %v1304_v26, %v1302_v2 }
 0xa8e   : > { %v919_v14 = vpack.c.bf16 %v918_v13, %v918_v13 }
 0xa90   : > { %1219 = vmatmul.mubr.msk.bf16.vlgmr.msra.gmra.mxu1 %vm411_vm4, %v919_v14 }
 0xb50   : > { %v962_v15 = vpop.f32.mrf.mxu1 }
 0xb51   : > { %v969_v16 = vpack.c.bf16 %v962_v15, %v962_v15 }
 0xb52   : > { %v1220_v17 = vpop.f32.mrf.mxu1 }
 0xb53   : > { %1225 = vmatmul.mubr.msk.bf16.vlgmr.msra.gmra.mxu0 %vm364_vm3, %v969_v16 }
 0xb54   : > { %v965_v18 = vpop.f32.mrf.mxu1 }
 0xb56   : > { %v1221_v19 = vpop.f32.mrf.mxu1 }
 0xc13   : > { %v1015_v21 = vpop.f32.mrf.mxu0 }
 0xc14   : > { %v1021_v23 = vadd.f32 %v1015_v21, %v968_v20 }
 0xc15   : > { %v1226_v25 = vpop.f32.mrf.mxu0 }
 0xc16   : > { %1022 = vst.msk [vmem:[#allocation2] sm:$0xff] %vm249_vm0, %v1021_v23 }
 0xc17   : > { %v1018_v27 = vpop.f32.mrf.mxu0 }
 0xc19   : > { %v1227_v28 = vpop.f32.mrf.mxu0 }
 0xc1d   : > { %v1023_v29 = vld [vmem:[#allocation2] sm:$0xff] }
 0xc1e   : > { %1024 = vst.msk [vmem:[%s242_s16] sm:$0xff] %vm249_vm0, %v1023_v29 }
 0xc1f   : > { %1318 = shalt.err (!%p1315_p3)
}
 0xc20   : > { %s1319_s10 = scalar_lea.hbm %s1598_s20, 128  ;;  %s1323_s13 = scalar_lea.hbm %s1640_s6, 256 }
 0xc21   : > { %p1320_p4 = scmp.ne.s32.totalorder %s1598_s20, %s1319_s10  ;;  %p1324_p9 = scmp.lt.s32.totalorder %s1598_s20, %s1640_s6 }
 0xc22   : > { %p1325_p10 = scmp.lt.s32.totalorder %s1323_s13, %s1319_s10 }
 0xc23   : > { %p1321_p7 = pnand %p1320_p4, %p1451_p5 }
 0xc24   : > { %p1326_p11 = por %p1325_p10, %p1324_p9 }
 0xc25   : > { %p1322_p8 = pneg %p1321_p7 }
 0xc27   : > { %p1327_p12 = pnand %p1326_p11, %p1322_p8 }
 0xc29   : > { %1330 = shalt.err (!%p1327_p12)
}
 0xc2a   : > { %1228 = dma.vmem_to_hbm [thread:$0]  (%p1451_p5), %s1040_s17, 128, %s1598_s20, %s1026_s26  }
 0xc2b PF: > { %p1234_p13 = scmp.ge.s32.totalorder %s1365_s24, 2  ;;  %s1051_s16 = sand.u32 1, %s1353_s21  }
 0xc2c   : > { %s1052_s18 = scalar_lea.sflag [#allocation4], %s1051_s16 }
 0xc2d   : > { %p1231_p0 = pnand %p1234_p13, %p1455_p6 }
 0xc2f   : > { %p1232_p1 = pneg %p1231_p0 }
 0xc31   : > { %1348 = dma.done.wait (%p1232_p1), %s1052_s18, 128  }
 0xc32   : > { %1350 = vsyncadd (%p1232_p1), %s1052_s18, 4294967168  ;;  %p16_p2 = scmp.ge.s32.totalorder %s1438_s27, 4   ;;  %s1643_s21 = smov %s1357_s22 }
 0xc33   : > { %s1644_s22 = smov %s1361_s23  ;;  %s1645_s23 = smov %s1449_s30 }
 0xc34   : > { %s1646_s24 = smov %s1438_s27  ;;  %18 = sbr.rel (!%p16_p2) target bundleno = 3 (0x3), region = 79 }
 0xc39   :  { %1057 = vsyncpa [#allocation4], 1 }
 0xc3a   :  { %1059 = vsyncpa [#allocation4 + $0x1], 1 }

// kernel: tpu_custom_call.1
= control target key start
LH: loop header
LB: loop body
LE: loop exit
PB: predicated region body
PF: predicated region fallthrough
CT: control target
= control target key end

     0   :  { %11 = vsyncpa [#allocation4], 0  ;;  %s1634_s0 = inlined_call_operand.vmem [shape: f32[2,8,32], index: 0, kind: input, shape index: {}]   ;;  %s1635_s1 = inlined_call_operand.vmem [shape: f32[1,32], index: 1, kind: input, shape index: {}]   ;;  %s1636_s2 = inlined_call_operand.vmem [shape: f32[1,32], index: 2, kind: input, shape index: {}]   ;;  %s1637_s3 = inlined_call_operand.vmem [shape: bf16[32,192], index: 3, kind: input, shape index: {}]   ;;  %s1638_s4 = inlined_call_operand.vmem [shape: bf16[64,32], index: 4, kind: input, shape index: {}]   ;;  %s1639_s5 = inlined_call_operand.vmem [shape: f32[1,32], index: 5, kind: input, shape index: {}]   ;;  %s1640_s6 = inlined_call_operand.hbm [shape: f32[2,8,32], index: 6, kind: output, shape index: {}]  }
   0x1   :  { %13 = vsyncpa [#allocation4 + $0x1], 0  ;;  %s1413_s21 = smov 0   ;;  %s1415_s22 = smov 0  }
   0x2   :  { %s1417_s23 = smov 0   ;;  %s1419_s24 = smov 0  }
   0x3 LB: > { %s1434_s25 = sadd.s32 4294967295, %s1365_s24   ;;  %s1098_s26 = sadd.s32 4294967294, %s1365_s24   ;;  %s1365_s24 = sphi %s1419_s24, %s1646_s24   ;;  %s1361_s23 = sphi %s1417_s23, %s1645_s23   ;;  %s1357_s22 = sphi %s1415_s22, %s1644_s22   ;;  %s1353_s21 = sphi %s1413_s21, %s1643_s21  }
   0x4   : > { %s1438_s27 = sadd.s32 1, %s1365_s24   ;;  %s157_s28 = sadd.s32 1, %s1361_s23 }
   0x5   : > { %s154_s29 = ssub.s32 %s1365_s24, %s1438_s27  ;;  %p167_p0 = scmp.ne.s32.totalorder %s1361_s23, %s1357_s22 }
   0x6   : > { %p155_p1 = scmp.eq.s32.totalorder %s154_s29, 0  ;;  %p168_p2 = scmp.eq.s32.totalorder %s1434_s25, 1 }
   0x7   : > { %p173_p3 = scmp.ne.s32.totalorder %s1357_s22, %s1353_s21  ;;  %p174_p4 = scmp.eq.s32.totalorder %s1098_s26, 1 }
   0x8   : > { %s1449_s30 = scalar_select %p155_p1, %s1361_s23, %s157_s28  }
   0x9   : > { %p1451_p5 = por %p168_p2, %p167_p0  ;;  %p1455_p6 = por %p174_p4, %p173_p3 }
   0xa   : > { %p1101_p7 = scmp.ge.s32.totalorder %s1365_s24, 1  ;;  %p214_p8 = scmp.lt.s32.totalorder %s1365_s24, 3 }
   0xc   : > { %p215_p9 = pnand %p1101_p7, %p214_p8 }
   0xd   : > { %p243_p10 = scmp.lt.s32.totalorder (!%p215_p9), %s1434_s25, 1  ;;  %s1370_s11 = smov (!%p215_p9), 64  }
   0xe   : > { %218 = sbr.rel (%p215_p9) target bundleno = 3115 (0xc2b), region = 44  ;;  %s1371_s12 = smov (!%p215_p9), 112  }
   0xf   : > { %s1373_s18 = smov (!%p215_p9), 32   ;;  %s1374_s19 = smov (!%p215_p9), 96  }
  0x10   : > { %s1375_s28 = smov (!%p215_p9), 16   ;;  %s1376_s29 = smov (!%p215_p9), 80  }
  0x11   : > { %s1129_s15 = sshll.u32 (!%p215_p9), %s1434_s25, 7 }
  0x12   : > { %s1598_s20 = scalar_lea.hbm (!%p215_p9), %s1640_s6, %s1129_s15 }
  0x13   : > { %s244_s9 = scalar_select %p243_p10, %s1434_s25, 1  ;;  %vm249_vm0 = vcmask 261120   ;;  %v1277_v7 = vld [vmem:[%s1637_s3 + $0x14] ss:$8 sps:$4 sm:$0xff]   ;;  %v1279_v8 = vld [vmem:[%s1637_s3 + $0x10] ss:$8 sps:$4 sm:$0xff]  }
  0x14   : > { %v1280_v9 = vld [vmem:[%s1637_s3 + $0x4] ss:$8 sps:$4 sm:$0xff]   ;;  %320 = vmatprep.subr.bf16.mxu0 %v1277_v7  ;;  %v1367_v10 = vmov 0   ;;  %v1282_v11 = vld [vmem:[%s1637_s3] ss:$8 sps:$4 sm:$0xff]   ;;  %v1368_v22 = vmov 0.0  }
  0x15   : > { %s1103_s10 = sshll.u32 %s244_s9, 3  ;;  %340 = vmatprep.mubr.bf16.mxu0 %v1367_v10  ;;  %321 = vmatpush1.bf16.msra.mxu0 %v1279_v8  ;;  %v1104_v16 = vld [vmem:[%s1635_s1] ss:$0 sm:$0xff]  ;;  %vm1369_vm1 = vmmov 0   ;;  %vm427_vm2 = vcmask 1043456   ;;  %vm364_vm3 = vcmask 130048  }
  0x16   : > { %s246_s13 = scalar_lea.vmem %s1634_s0, %s1103_s10  ;;  %322 = vmatprep.subr.bf16.mxu0 %v1280_v9  ;;  %v1105_v18 = vld [vmem:[%s1636_s2] ss:$0 sm:$0xff]  ;;  %1156 = vmatprep.subr.bf16.mxu1 %v1368_v22  ;;  %vm411_vm4 = vcmask 64512  }
  0x17   : > { %v248_v0 = vld [vmem:[%s246_s13] sm:$0xff]  ;;  %1158 = vmatprep.mubr.msk.bf16.mxu1 %vm1369_vm1, %v1368_v22  ;;  %s1372_s13 = smov 48  }
  0x18   : > { %v250_v1 = vsel %vm249_vm0, %v248_v0, 0.0  ;;  %v1283_v44 = vld [vmem:[%s1638_s4] sm:$0xff]  }
  0x19   : > { %251 = vadd.xlane.f32.xlu0 %v250_v1  ;;  %323 = vmatpush1.bf16.msra.mxu0 %v1282_v11 }
  0x1a   : > { %1162 = vmatprep.subr.bf16.mxu0 %v1368_v22 }
  0xa2   : > { %v252_v2 = vpop.xlane.xlu0 %251 }
  0xa3   : > { %v254_v3 = vmul.f32 0.03125, %v252_v2 }
  0xa5   : > { %v255_v4 = vsub.f32 %v248_v0, %v254_v3  ;;  %v1111_v0 = vld [vmem:[%s1639_s5] ss:$0 sm:$0xff] }
  0xa6   : > { %356 = vst.msk [vmem:[#allocation2] sm:$0xff] %vm249_vm0, %v1111_v0 }
  0xa7   : > { %v256_v5 = vmul.f32 %v255_v4, %v255_v4 }
  0xa9   : > { %v257_v6 = vsel %vm249_vm0, %v256_v5, 0.0 }
  0xaa   : > { %258 = vadd.xlane.f32.xlu0 %v257_v6 }
  0xad   : > { %v471_v6 = vld [vmem:[#allocation2] sm:$0xff] }
 0x133   : > { %v259_v12 = vpop.xlane.xlu0 %258 }
 0x134   : > { %v260_v13 = vmul.f32 0.03125, %v259_v12 }
 0x136   : > { %v261_v14 = vadd.f32 1e-05, %v260_v13 }
 0x138   : > { %1287 = vrsqrt.f32 %v261_v14 }
 0x145   : > { %v1288_v15 = vpop.eup %1287 }
 0x146   : > { %v263_v17 = vmul.f32 %v1288_v15, %v255_v4 }
 0x148   : > { %v271_v19 = vmul.f32 %v1104_v16, %v263_v17 }
 0x14a   : > { %v279_v20 = vadd.f32 %v1105_v18, %v271_v19  ;;  %v1284_v19 = vld [vmem:[%s1638_s4 + $0x8] sm:$0xff]  }
 0x14c   : > { %v280_v21 = vpack.c.bf16 %v279_v20, %v279_v20 }
 0x14e   : > { %1110 = vmatmul.mubr.msk.bf16.vlgmr.msra.gmra.mxu0 %vm249_vm0, %v280_v21 }
 0x14f   : > { %1164 = vmatprep.mubr.msk.bf16.mxu0 %vm1369_vm1, %v1368_v22 }
 0x20e   : > { %v342_v23 = vpop.f32.mrf.mxu0 }
 0x20f   : > { %v1493_v24 = vpack.c.bf16 %v342_v23, %v342_v23  ;;  %v357_v32 = vmul.f32 0.25, %v342_v23 }
 0x210   : > { %v344_v25 = vpop.f32.mrf.mxu0 }
 0x211   : > { %v1495_v26 = vpack.c.bf16 %v344_v25, %v344_v25  ;;  %362 = vrot.lane.b32.xlu1 %v1493_v24, %s1370_s11  ;;  %v1503_v33 = vpack.c.bf16 %v357_v32, %v357_v32 }
 0x212   : > { %v346_v27 = vpop.f32.mrf.mxu0 }
 0x213   : > { %v429_v28 = vsel %vm427_vm2, %v1495_v26, 0 }
 0x214   : > { %v347_v29 = vpop.f32.mrf.mxu0  ;;  %1163 = vmatpush3.bf16.msra.mxu0 %v429_v28 }
 0x215   : > { %1174 = vmatprep.subr.bf16.mxu0 %v1368_v22 }
 0x283   : > { %v363_v30 = vpop.permute.xlu1 %362 }
 0x284   : > { %v369_v31 = vsel %vm364_vm3, %v363_v30, 0 }
 0x285   : > { %1157 = vmatpush3.bf16.xpose.msra.mxu1 %v369_v31 }
 0x286   : > { %1168 = vmatprep.subr.bf16.mxu1 %v1368_v22 }
 0x28c   : > { %1159 = vmatmul.mubr.msk.bf16.vlgmr.msra.gmra.mxu1 %vm364_vm3, %v1503_v33 }
 0x28d   : > { %1170 = vmatprep.mubr.msk.bf16.mxu1 %vm1369_vm1, %v1368_v22  ;;  %1169 = vmatpush3.bf16.msra.mxu1 %v1283_v44 }
 0x28e   : > { %1180 = vmatprep.subr.bf16.mxu1 %v1368_v22 }
 0x34c   : > { %v405_v34 = vpop.f32.mrf.mxu1 }
 0x34d   : > { %v412_v35 = vsel %vm411_vm4, %v405_v34, -inf }
 0x34e   : > { %413 = vmax.xlane.f32.xlu1 %v412_v35  ;;  %v1160_v36 = vpop.f32.mrf.mxu1 }
 0x350   : > { %v408_v37 = vpop.f32.mrf.mxu1 }
 0x352   : > { %v1161_v38 = vpop.f32.mrf.mxu1 }
 0x35f   : > { %590 = vrot.lane.b32.xlu1 %v1495_v26, %s1371_s12 }
 0x3d7   : > { %v414_v39 = vpop.xlane.xlu1 %413 }
 0x3d8   : > { %v415_v40 = vsub.f32 %v405_v34, %v414_v39 }
 0x3da   : > { %v416_v41 = vmul.f32 1.442695, %v415_v40 }
 0x3db   : > { %v591_v52 = vpop.permute.xlu1 %590 }
 0x3dc   : > { %1289 = vpow2.f32 %v416_v41  ;;  %v596_v56 = vsel %vm427_vm2, %v591_v52, 0  ;;  %v1285_v52 = vld [vmem:[%s1638_s4 + $0x10] sm:$0xff]  }
 0x3e9   : > { %v1290_v42 = vpop.eup %1289 }
 0x3ea   : > { %v418_v43 = vsel %vm411_vm4, %v1290_v42, 0.0 }
 0x3eb   : > { %419 = vadd.xlane.f32.xlu0 %v418_v43 }
 0x401   : > { %529 = vrot.lane.b32.xlu0 %v1493_v24, %s1372_s13  ;;  %s240_s13 = sand.u32 1, %s1357_s22  }
 0x402   : > { %s1102_s14 = sshll.u32 %s240_s13, 3  ;;  %s1026_s26 = scalar_lea.sflag [#allocation4], %s240_s13 }
 0x403   : > { %s242_s16 = scalar_lea.vmem [#allocation3], %s1102_s14 }
 0x404   : > { %s1039_s17 = sshll.u32 %s242_s16, 4  ;;  %s1040_s17 = int_to_ptr.vmem [resolvable:$true] %s1039_s17 }
 0x405   : > { %527 = vrot.lane.b32.xlu0 %v1503_v33, %s1371_s12 }
 0x474   : > { %v420_v45 = vpop.xlane.xlu0 %419 }
 0x475   : > { %1291 = vrcp.f32 %v420_v45 }
 0x478   : > { %v530_v48 = vpop.permute.xlu0 %529 }
 0x479   : > { %v535_v50 = vsel %vm364_vm3, %v530_v48, 0 }
 0x47c   : > { %v528_v51 = vpop.permute.xlu0 %527 }
 0x482   : > { %v1292_v46 = vpop.eup %1291 }
 0x483   : > { %v422_v47 = vmul.f32 %v1292_v46, %v1290_v42 }
 0x485   : > { %v423_v49 = vpack.c.bf16 %v422_v47, %v422_v47 }
 0x487   : > { %1165 = vmatmul.mubr.msk.bf16.vlgmr.msra.gmra.mxu0 %vm411_vm4, %v423_v49 }
 0x488   : > { %1175 = vmatpush3.bf16.xpose.msra.mxu0 %v535_v50  ;;  %1176 = vmatprep.mubr.msk.bf16.mxu0 %vm1369_vm1, %v1368_v22 }
 0x489   : > { %1186 = vmatprep.subr.bf16.mxu0 %v1368_v22 }
 0x48f   : > { %1177 = vmatmul.mubr.msk.bf16.vlgmr.msra.gmra.mxu0 %vm364_vm3, %v528_v51 }
 0x490   : > { %1188 = vmatprep.mubr.msk.bf16.mxu0 %vm1369_vm1, %v1368_v22  ;;  %1187 = vmatpush3.bf16.msra.mxu0 %v1284_v19 }
 0x491   : > { %1198 = vmatprep.subr.bf16.mxu0 %v1368_v22 }
 0x547   : > { %v465_v53 = vpop.f32.mrf.mxu0 }
 0x548   : > { %v472_v54 = vpack.c.bf16 %v465_v53, %v465_v53 }
 0x549   : > { %v1166_v55 = vpop.f32.mrf.mxu0 }
 0x54a   : > { %1171 = vmatmul.mubr.msk.bf16.vlgmr.msra.gmra.mxu1 %vm364_vm3, %v472_v54 }
 0x54b   : > { %1181 = vmatpush3.bf16.msra.mxu1 %v596_v56  ;;  %v468_v57 = vpop.f32.mrf.mxu0  ;;  %1182 = vmatprep.mubr.msk.bf16.mxu1 %vm1369_vm1, %v1368_v22 }
 0x54c   : > { %1192 = vmatprep.subr.bf16.mxu1 %v1368_v22 }
 0x54d   : > { %v1167_v58 = vpop.f32.mrf.mxu0 }
 0x54f   : > { %v571_v59 = vpop.f32.mrf.mxu0 }
 0x550   : > { %v577_v60 = vsel %vm411_vm4, %v571_v59, -inf }
 0x551   : > { %578 = vmax.xlane.f32.xlu0 %v577_v60  ;;  %v1178_v61 = vpop.f32.mrf.mxu0 }
 0x553   : > { %v574_v62 = vpop.f32.mrf.mxu0 }
 0x555   : > { %v1179_v63 = vpop.f32.mrf.mxu0 }
 0x5da   : > { %v579_v1 = vpop.xlane.xlu0 %578 }
 0x5db   : > { %v580_v2 = vsub.f32 %v571_v59, %v579_v1 }
 0x5dd   : > { %v581_v3 = vmul.f32 1.442695, %v580_v2 }
 0x5df   : > { %1293 = vpow2.f32 %v581_v3 }
 0x5ec   : > { %v1294_v4 = vpop.eup %1293 }
 0x5ed   : > { %v583_v5 = vsel %vm411_vm4, %v1294_v4, 0.0 }
 0x5ee   : > { %584 = vadd.xlane.f32.xlu1 %v583_v5  ;;  %v1286_v5 = vld [vmem:[%s1638_s4 + $0x18] sm:$0xff]  }
 0x5ff   : > { %695 = vrot.lane.b32.xlu1 %v1493_v24, %s1373_s18 }
 0x603   : > { %693 = vrot.lane.b32.xlu1 %v1503_v33, %s1374_s19 }
 0x60a   : > { %v518_v7 = vpop.f32.mrf.mxu1 }
 0x60b   : > { %v524_v8 = vadd.f32 %v518_v7, %v471_v6 }
 0x60c   : > { %v1172_v9 = vpop.f32.mrf.mxu1 }
 0x60d   : > { %525 = vst.msk [vmem:[#allocation2] sm:$0xff] %vm249_vm0, %v524_v8 }
 0x60e   : > { %v521_v10 = vpop.f32.mrf.mxu1 }
 0x610   : > { %v1173_v11 = vpop.f32.mrf.mxu1 }
 0x614   : > { %v638_v41 = vld [vmem:[#allocation2] sm:$0xff] }
 0x677   : > { %v585_v12 = vpop.xlane.xlu1 %584 }
 0x678   : > { %1295 = vrcp.f32 %v585_v12 }
 0x67b   : > { %v696_v15 = vpop.permute.xlu1 %695 }
 0x67c   : > { %v701_v17 = vsel %vm364_vm3, %v696_v15, 0 }
 0x67f   : > { %v694_v18 = vpop.permute.xlu1 %693 }
 0x685   : > { %v1296_v13 = vpop.eup %1295 }
 0x686   : > { %v587_v14 = vmul.f32 %v1296_v13, %v1294_v4 }
 0x688   : > { %v588_v16 = vpack.c.bf16 %v587_v14, %v587_v14 }
 0x68a   : > { %1183 = vmatmul.mubr.msk.bf16.vlgmr.msra.gmra.mxu1 %vm411_vm4, %v588_v16 }
 0x68b   : > { %1193 = vmatpush3.bf16.xpose.msra.mxu1 %v701_v17  ;;  %1194 = vmatprep.mubr.msk.bf16.mxu1 %vm1369_vm1, %v1368_v22 }
 0x68c   : > { %1204 = vmatprep.subr.bf16.mxu1 %v1368_v22 }
 0x692   : > { %1195 = vmatmul.mubr.msk.bf16.vlgmr.msra.gmra.mxu1 %vm364_vm3, %v694_v18 }
 0x693   : > { %1206 = vmatprep.mubr.msk.bf16.mxu1 %vm1369_vm1, %v1368_v22  ;;  %1205 = vmatpush3.bf16.msra.mxu1 %v1285_v52 }
 0x694   : > { %1216 = vmatprep.subr.bf16.mxu1 %v1368_v22 }
 0x74a   : > { %v632_v20 = vpop.f32.mrf.mxu1 }
 0x74b   : > { %v639_v21 = vpack.c.bf16 %v632_v20, %v632_v20 }
 0x74c   : > { %v1184_v23 = vpop.f32.mrf.mxu1 }
 0x74d   : > { %1189 = vmatmul.mubr.msk.bf16.vlgmr.msra.gmra.mxu0 %vm364_vm3, %v639_v21 }
 0x74e   : > { %v635_v25 = vpop.f32.mrf.mxu1  ;;  %1200 = vmatprep.mubr.msk.bf16.mxu0 %vm1369_vm1, %v1368_v22 }
 0x750   : > { %v1185_v27 = vpop.f32.mrf.mxu1 }
 0x752   : > { %v737_v28 = vpop.f32.mrf.mxu1 }
 0x753   : > { %v743_v29 = vsel %vm411_vm4, %v737_v28, -inf }
 0x754   : > { %744 = vmax.xlane.f32.xlu0 %v743_v29  ;;  %v1196_v30 = vpop.f32.mrf.mxu1 }
 0x756   : > { %v740_v31 = vpop.f32.mrf.mxu1 }
 0x758   : > { %v1197_v32 = vpop.f32.mrf.mxu1 }
 0x76a   : > { %755 = vrot.lane.b32.xlu0 %v1495_v26, %s1374_s19 }
 0x76e   : > { %860 = vrot.lane.b32.xlu0 %v1493_v24, %s1375_s28  ;;  %s1305_s28 = scalar_lea.vmem %s1040_s17, 128 }
 0x76f   : > { %p1306_p11 = scmp.ne.s32.totalorder %s1040_s17, %s1305_s28 }
 0x771   : > { %p1307_p12 = pnand %p1306_p11, %p1451_p5 }
 0x772   : > { %858 = vrot.lane.b32.xlu0 %v1503_v33, %s1376_s29 }
 0x773   : > { %p1308_p13 = pneg %p1307_p12 }
 0x7dd   : > { %v745_v34 = vpop.xlane.xlu0 %744 }
 0x7de   : > { %v746_v35 = vsub.f32 %v737_v28, %v745_v34 }
 0x7e0   : > { %v747_v36 = vmul.f32 1.442695, %v746_v35 }
 0x7e1   : > { %v756_v37 = vpop.permute.xlu0 %755 }
 0x7e2   : > { %1297 = vpow2.f32 %v747_v36  ;;  %v761_v38 = vsel %vm427_vm2, %v756_v37, 0 }
 0x7e3   : > { %1199 = vmatpush3.bf16.msra.mxu0 %v761_v38 }
 0x7e4   : > { %1210 = vmatprep.subr.bf16.mxu0 %v1368_v22 }
 0x7e5   : > { %v861_v48 = vpop.permute.xlu0 %860 }
 0x7e6   : > { %v866_v50 = vsel %vm364_vm3, %v861_v48, 0 }
 0x7e9   : > { %v859_v51 = vpop.permute.xlu0 %858 }
 0x7ef   : > { %v1298_v39 = vpop.eup %1297 }
 0x7f0   : > { %v749_v40 = vsel %vm411_vm4, %v1298_v39, 0.0 }
 0x7f1   : > { %750 = vadd.xlane.f32.xlu1 %v749_v40 }
 0x80d   : > { %v685_v24 = vpop.f32.mrf.mxu0 }
 0x80e   : > { %v691_v42 = vadd.f32 %v685_v24, %v638_v41 }
 0x80f   : > { %v1190_v43 = vpop.f32.mrf.mxu0 }
 0x810   : > { %692 = vst.msk [vmem:[#allocation2] sm:$0xff] %vm249_vm0, %v691_v42 }
 0x811   : > { %v688_v33 = vpop.f32.mrf.mxu0 }
 0x813   : > { %v1191_v44 = vpop.f32.mrf.mxu0 }
 0x87a   : > { %v751_v45 = vpop.xlane.xlu1 %750 }
 0x87b   : > { %1299 = vrcp.f32 %v751_v45 }
 0x888   : > { %v1300_v46 = vpop.eup %1299 }
 0x889   : > { %v753_v47 = vmul.f32 %v1300_v46, %v1298_v39 }
 0x88b   : > { %v754_v49 = vpack.c.bf16 %v753_v47, %v753_v47 }
 0x88d   : > { %1201 = vmatmul.mubr.msk.bf16.vlgmr.msra.gmra.mxu0 %vm411_vm4, %v754_v49 }
 0x88e   : > { %1211 = vmatpush3.bf16.xpose.msra.mxu0 %v866_v50  ;;  %1212 = vmatprep.mubr.msk.bf16.mxu0 %vm1369_vm1, %v1368_v22 }
 0x88f   : > { %1222 = vmatprep.subr.bf16.mxu0 %v1368_v22 }
 0x895   : > { %1213 = vmatmul.mubr.msk.bf16.vlgmr.msra.gmra.mxu0 %vm364_vm3, %v859_v51 }
 0x896   : > { %1224 = vmatprep.mubr.msk.bf16.mxu0 %vm1369_vm1, %v1368_v22  ;;  %1223 = vmatpush3.bf16.msra.mxu0 %v1286_v5 }
 0x94d   : > { %v797_v53 = vpop.f32.mrf.mxu0 }
 0x94e   : > { %v804_v54 = vpack.c.bf16 %v797_v53, %v797_v53 }
 0x94f   : > { %v1202_v55 = vpop.f32.mrf.mxu0 }
 0x950   : > { %1207 = vmatmul.mubr.msk.bf16.vlgmr.msra.gmra.mxu1 %vm364_vm3, %v804_v54 }
 0x951   : > { %v800_v56 = vpop.f32.mrf.mxu0  ;;  %1218 = vmatprep.mubr.msk.bf16.mxu1 %vm1369_vm1, %v1368_v22  ;;  %v803_v22 = vld [vmem:[#allocation2] sm:$0xff] }
 0x953   : > { %v1203_v57 = vpop.f32.mrf.mxu0 }
 0x955   : > { %v902_v58 = vpop.f32.mrf.mxu0 }
 0x956   : > { %v908_v59 = vsel %vm411_vm4, %v902_v58, -inf }
 0x957   : > { %909 = vmax.xlane.f32.xlu0 %v908_v59  ;;  %v1214_v60 = vpop.f32.mrf.mxu0 }
 0x959   : > { %v905_v61 = vpop.f32.mrf.mxu0 }
 0x95b   : > { %v1215_v62 = vpop.f32.mrf.mxu0 }
 0x9e0   : > { %v910_v63 = vpop.xlane.xlu0 %909 }
 0x9e1   : > { %v911_v0 = vsub.f32 %v902_v58, %v910_v63 }
 0x9e3   : > { %v912_v1 = vmul.f32 1.442695, %v911_v0 }
 0x9e5   : > { %1301 = vpow2.f32 %v912_v1 }
 0x9f2   : > { %v1302_v2 = vpop.eup %1301 }
 0x9f3   : > { %v914_v3 = vsel %vm411_vm4, %v1302_v2, 0.0 }
 0x9f4   : > { %915 = vadd.xlane.f32.xlu1 %v914_v3 }
 0xa05   : > { %920 = vrot.lane.b32.xlu1 %v1495_v26, %s1376_s29  ;;  %s1377_s29 = smov [#allocation3]  }
 0xa06   : > { %s1309_s9 = sshll.u32 %s1377_s29, 4  ;;  %s1310_s9 = int_to_ptr.vmem [resolvable:$false] %s1309_s9 }
 0xa07   : > { %s1311_s25 = scalar_lea.vmem %s1310_s9, 256  ;;  %p1312_p0 = scmp.lt.s32.totalorder %s1040_s17, %s1310_s9 }
 0xa08   : > { %p1313_p1 = scmp.lt.s32.totalorder %s1311_s25, %s1305_s28 }
 0xa0a   : > { %p1314_p2 = por %p1313_p1, %p1312_p0 }
 0xa0c   : > { %p1315_p3 = pnand %p1314_p2, %p1308_p13 }
 0xa10   : > { %v850_v4 = vpop.f32.mrf.mxu1 }
 0xa11   : > { %v856_v6 = vadd.f32 %v850_v4, %v803_v22 }
 0xa12   : > { %v1208_v7 = vpop.f32.mrf.mxu1 }
 0xa13   : > { %857 = vst.msk [vmem:[#allocation2] sm:$0xff] %vm249_vm0, %v856_v6 }
 0xa14   : > { %v853_v8 = vpop.f32.mrf.mxu1 }
 0xa16   : > { %v1209_v9 = vpop.f32.mrf.mxu1 }
 0xa1a   : > { %v968_v20 = vld [vmem:[#allocation2] sm:$0xff] }
 0xa7d   : > { %v916_v10 = vpop.xlane.xlu1 %915 }
 0xa7e   : > { %1303 = vrcp.f32 %v916_v10 }
 0xa81   : > { %v921_v11 = vpop.permute.xlu1 %920 }
 0xa82   : > { %v926_v12 = vsel %vm427_vm2, %v921_v11, 0 }
 0xa83   : > { %1217 = vmatpush3.bf16.msra.mxu1 %v926_v12 }
 0xa8b   : > { %v1304_v26 = vpop.eup %1303 }
 0xa8c   : > { %v918_v13 = vmul.f32 %v1304_v26, %v1302_v2 }
 0xa8e   : > { %v919_v14 = vpack.c.bf16 %v918_v13, %v918_v13 }
 0xa90   : > { %1219 = vmatmul.mubr.msk.bf16.vlgmr.msra.gmra.mxu1 %vm411_vm4, %v919_v14 }
 0xb50   : > { %v962_v15 = vpop.f32.mrf.mxu1 }
 0xb51   : > { %v969_v16 = vpack.c.bf16 %v962_v15, %v962_v15 }
 0xb52   : > { %v1220_v17 = vpop.f32.mrf.mxu1 }
 0xb53   : > { %1225 = vmatmul.mubr.msk.bf16.vlgmr.msra.gmra.mxu0 %vm364_vm3, %v969_v16 }
 0xb54   : > { %v965_v18 = vpop.f32.mrf.mxu1 }
 0xb56   : > { %v1221_v19 = vpop.f32.mrf.mxu1 }
 0xc13   : > { %v1015_v21 = vpop.f32.mrf.mxu0 }
 0xc14   : > { %v1021_v23 = vadd.f32 %v1015_v21, %v968_v20 }
 0xc15   : > { %v1226_v25 = vpop.f32.mrf.mxu0 }
 0xc16   : > { %1022 = vst.msk [vmem:[#allocation2] sm:$0xff] %vm249_vm0, %v1021_v23 }
 0xc17   : > { %v1018_v27 = vpop.f32.mrf.mxu0 }
 0xc19   : > { %v1227_v28 = vpop.f32.mrf.mxu0 }
 0xc1d   : > { %v1023_v29 = vld [vmem:[#allocation2] sm:$0xff] }
 0xc1e   : > { %1024 = vst.msk [vmem:[%s242_s16] sm:$0xff] %vm249_vm0, %v1023_v29 }
 0xc1f   : > { %1318 = shalt.err (!%p1315_p3)
}
 0xc20   : > { %s1319_s10 = scalar_lea.hbm %s1598_s20, 128  ;;  %s1323_s13 = scalar_lea.hbm %s1640_s6, 256 }
 0xc21   : > { %p1320_p4 = scmp.ne.s32.totalorder %s1598_s20, %s1319_s10  ;;  %p1324_p9 = scmp.lt.s32.totalorder %s1598_s20, %s1640_s6 }
 0xc22   : > { %p1325_p10 = scmp.lt.s32.totalorder %s1323_s13, %s1319_s10 }
 0xc23   : > { %p1321_p7 = pnand %p1320_p4, %p1451_p5 }
 0xc24   : > { %p1326_p11 = por %p1325_p10, %p1324_p9 }
 0xc25   : > { %p1322_p8 = pneg %p1321_p7 }
 0xc27   : > { %p1327_p12 = pnand %p1326_p11, %p1322_p8 }
 0xc29   : > { %1330 = shalt.err (!%p1327_p12)
}
 0xc2a   : > { %1228 = dma.vmem_to_hbm [thread:$0]  (%p1451_p5), %s1040_s17, 128, %s1598_s20, %s1026_s26  }
 0xc2b PF: > { %p1234_p13 = scmp.ge.s32.totalorder %s1365_s24, 2  ;;  %s1051_s16 = sand.u32 1, %s1353_s21  }
 0xc2c   : > { %s1052_s18 = scalar_lea.sflag [#allocation4], %s1051_s16 }
 0xc2d   : > { %p1231_p0 = pnand %p1234_p13, %p1455_p6 }
 0xc2f   : > { %p1232_p1 = pneg %p1231_p0 }
 0xc31   : > { %1348 = dma.done.wait (%p1232_p1), %s1052_s18, 128  }
 0xc32   : > { %1350 = vsyncadd (%p1232_p1), %s1052_s18, 4294967168  ;;  %p16_p2 = scmp.ge.s32.totalorder %s1438_s27, 4   ;;  %s1643_s21 = smov %s1357_s22 }
 0xc33   : > { %s1644_s22 = smov %s1361_s23  ;;  %s1645_s23 = smov %s1449_s30 }
 0xc34   : > { %s1646_s24 = smov %s1438_s27  ;;  %18 = sbr.rel (!%p16_p2) target bundleno = 3 (0x3), region = 79 }
 0xc39   :  { %1057 = vsyncpa [#allocation4], 1 }
 0xc3a   :  { %1059 = vsyncpa [#allocation4 + $0x1], 1 }

</bundles_post_ra>
